<compile_context>
chip_gen: v7x
topology: tpu7x:2x2x1
jax: 0.10.0
libtpu: 0.0.40
codegen_flags: <defaults>
</compile_context>

<pallas_src>
import jax
import jax.numpy as jnp
from jax import lax
from jax.experimental import pallas as pl
from jax.experimental.pallas import tpu as pltpu


# ---------------------------------------------------------------------------
# Kernel: whole 4-layer MLP on one TILE_B batch tile.
#   x_ref : (TILE_B, ND_p)  native layout, f32
#   w*    : (out, in)       compute dtype (bf16 or f32)
#   b*    : (out, 1)        f32
#   w3    : (H_p, 1)        f32 column (final layer, VPU reduce)
#   b3    : (1, 1)          f32 (base_acc already folded in)
#   o_ref : (1, TILE_B)     lane-dense output row
# ---------------------------------------------------------------------------
def _mlp_kernel(x_ref, w0_ref, b0_ref, w1_ref, b1_ref, w2_ref, b2_ref,
                w3_ref, b3_ref, o_ref):
    cdt = w0_ref.dtype  # matmul compute dtype (bf16 fast path or f32)

    # Layer 0: contract over the feature axis of the native-layout x tile.
    # Result is (H_p, TILE_B): batch lands on the lane axis for the rest of
    # the network; the transpose is handled per-tile inside the kernel.
    h = lax.dot_general(
        w0_ref[...], x_ref[...].astype(cdt),
        dimension_numbers=(((1,), (1,)), ((), ())),
        preferred_element_type=jnp.float32)
    h = jnp.maximum(h + b0_ref[...], 0.0)                      # f32 epilogue

    h = jnp.dot(w1_ref[...], h.astype(cdt),
                preferred_element_type=jnp.float32)
    h = jnp.maximum(h + b1_ref[...], 0.0)

    h = jnp.dot(w2_ref[...], h.astype(cdt),
                preferred_element_type=jnp.float32)
    h = jnp.maximum(h + b2_ref[...], 0.0)

    # Final H -> 1 layer: VPU multiply + sublane reduce (keeps the MXU free
    # from a degenerate N=1 matmul), producing a lane-dense (1, TILE_B) row.
    o_ref[...] = jnp.sum(h * w3_ref[...], axis=0, keepdims=True) + b3_ref[...]


# ---------------------------------------------------------------------------
# Host-side helpers
# ---------------------------------------------------------------------------
def _round_up(x, m):
    return (x + m - 1) // m * m


def init_params(key, n_dim, hidden_size):
    """PyTorch-style params: w_i is (out, in), b_i is (out,), base_acc zeros(1).
    Mimics nn.Linear default init (uniform +/- 1/sqrt(fan_in))."""
    dims = [(n_dim, hidden_size), (hidden_size, hidden_size),
            (hidden_size, hidden_size), (hidden_size, 1)]
    params = {}
    for i, (fan_in, fan_out) in enumerate(dims):
        key, kw, kb = jax.random.split(key, 3)
        bound = 1.0 / (fan_in ** 0.5)
        params[f"w{i}"] = jax.random.uniform(
            kw, (fan_out, fan_in), jnp.float32, minval=-bound, maxval=bound)
        params[f"b{i}"] = jax.random.uniform(
            kb, (fan_out,), jnp.float32, minval=-bound, maxval=bound)
    params["base_acc"] = jnp.zeros((1,), jnp.float32)  # frozen (requires_grad=False)
    return params


def prepare_kernel_params(params, n_dim, hidden, *, pad_multiple=128,
                          compute_dtype=jnp.bfloat16):
    """Zero-pad dims to `pad_multiple` (128 keeps the first-layer contraction
    lane-aligned; the real OFA H=400 becomes 512, a multiple of 256 for
    v6e/v7x MXUs).  Hidden-layer weights are stored in `compute_dtype`
    (bf16 fast path); biases and the final H->1 column stay f32, and the
    frozen base_acc is folded into the last bias."""
    nd_p = _round_up(n_dim, pad_multiple)
    h_p = _round_up(hidden, pad_multiple)

    def pad2(a, r, c):
        return jnp.pad(a, ((0, r - a.shape[0]), (0, c - a.shape[1])))

    kp = {
        "w0": pad2(params["w0"], h_p, nd_p).astype(compute_dtype),   # (H_p, ND_p)
        "b0": pad2(params["b0"][:, None], h_p, 1),                   # (H_p, 1) f32
        "w1": pad2(params["w1"], h_p, h_p).astype(compute_dtype),
        "b1": pad2(params["b1"][:, None], h_p, 1),
        "w2": pad2(params["w2"], h_p, h_p).astype(compute_dtype),
        "b2": pad2(params["b2"][:, None], h_p, 1),
        "w3": pad2(params["w3"].T, h_p, 1),                          # (H_p, 1) f32
        "b3": (params["b3"] + params["base_acc"]).reshape(1, 1),     # base folded
    }
    return kp


def accuracy_predictor_forward(x, kparams, *, tile_b=256):
    """x: [B, n_dim] float32 arch encodings. Returns [B] predicted accuracies.

    tile_b is the per-generation tunable batch tile:
      v6e/v7x: 256-512 fills the 2x256^2 MXU; v5e: 128-256 is already optimal.
    """
    B, n_dim = x.shape
    nd_p = kparams["w0"].shape[1]
    h_p = kparams["w1"].shape[0]

    b_pad = _round_up(B, tile_b)
    num_tiles = b_pad // tile_b
    # v7x megacore: keep the parallel grid axis even so both TCs stay busy.
    if num_tiles > 1 and num_tiles % 2 == 1:
        num_tiles += 1
        b_pad = num_tiles * tile_b

    # Native layout; pad feature dim (and batch to the tile size).  No host
    # transpose and no full zero-fill+scatter pass over the input.
    if b_pad == B and nd_p == n_dim:
        x_p = x
    else:
        x_p = jnp.pad(x, ((0, b_pad - B), (0, nd_p - n_dim)))

    def resident(arr):
        # Constant index_map -> stays VMEM-resident across grid steps;
        # Buffered(1) -> no pointless double buffer for the weights/biases.
        return pl.BlockSpec(arr.shape, lambda i: (0, 0),
                            pipeline_mode=pl.Buffered(1))

    grid_spec = pltpu.PrefetchScalarGridSpec(
        num_scalar_prefetch=0,
        grid=(num_tiles,),
        in_specs=[
            pl.BlockSpec((tile_b, nd_p), lambda i: (i, 0)),   # streamed x tile
            resident(kparams["w0"]), resident(kparams["b0"]),
            resident(kparams["w1"]), resident(kparams["b1"]),
            resident(kparams["w2"]), resident(kparams["b2"]),
            resident(kparams["w3"]), resident(kparams["b3"]),
        ],
        out_specs=pl.BlockSpec((1, tile_b), lambda i: (0, i)),  # lane-dense out
    )

    itemsize = lambda a: int(a.size) * a.dtype.itemsize
    param_bytes = sum(itemsize(v) for v in kparams.values())
    flops = 2 * b_pad * (h_p * nd_p + 2 * h_p * h_p + h_p)
    bytes_accessed = itemsize(x_p) + param_bytes + 4 * b_pad      # in + w + out

    # VMEM budget: single-buffered params + double-buffered x/out tiles + a few
    # (H_p, TILE_B) f32 activation temporaries.  Clamp to <=32 MiB so the same
    # setting is safe on v7x (64 MiB physical VMEM).
    live_bytes = (param_bytes
                  + 2 * tile_b * nd_p * 4
                  + 2 * tile_b * 4
                  + 4 * h_p * tile_b * 4)
    vmem_limit = int(min(max(2 * live_bytes, 16 * 1024 * 1024), 32 * 1024 * 1024))

    out = pl.pallas_call(
        _mlp_kernel,
        out_shape=jax.ShapeDtypeStruct((1, b_pad), jnp.float32),
        grid_spec=grid_spec,
        compiler_params=pltpu.CompilerParams(
            dimension_semantics=("parallel",),       # megacore split on v7x
            vmem_limit_bytes=vmem_limit,
        ),
        cost_estimate=pl.CostEstimate(
            flops=int(flops), transcendentals=0,
            bytes_accessed=int(bytes_accessed)),
    )(x_p,
      kparams["w0"], kparams["b0"],
      kparams["w1"], kparams["b1"],
      kparams["w2"], kparams["b2"],
      kparams["w3"], kparams["b3"])

    # squeeze + base_acc already handled (base folded into b3); drop batch pad.
    return out[0, :B]


def reference_forward(x, params):
    """Pure-JAX reference matching the PyTorch module exactly (f32)."""
    h = x
    for i in range(3):
        h = jnp.maximum(h @ params[f"w{i}"].T + params[f"b{i}"], 0.0)
    y = h @ params["w3"].T + params["b3"]
    return jnp.squeeze(y) + params["base_acc"]


if __name__ == "__main__":
    # Small shapes consistent with the module: batch=2 arch encodings,
    # n_dim=16 features, hidden_size=32 (stand-in for the real 400), n_layers=3.
    # TODO(synk): arch_encoder.arch2feature / checkpoint loading are host-side
    # preprocessing in the original module, not kernel work.
    B, N_DIM, HIDDEN = 2, 16, 32

    key = jax.random.PRNGKey(0)
    key, kx = jax.random.split(key)
    x = jax.random.normal(kx, (B, N_DIM), jnp.float32)
    params = init_params(key, N_DIM, HIDDEN)

    y_ref = reference_forward(x, params)

    # f32 path: bit-faithful to the PyTorch module.
    kp_f32 = prepare_kernel_params(params, N_DIM, HIDDEN,
                                   compute_dtype=jnp.float32)
    y_f32 = jax.block_until_ready(
        accuracy_predictor_forward(x, kp_f32, tile_b=256))
    assert y_f32.shape == (B,)
    assert jnp.allclose(y_f32, y_ref, atol=1e-5, rtol=1e-5)

    # bf16 MXU fast path: same kernel, weights in bf16, f32 accumulation.
    kp_bf16 = prepare_kernel_params(params, N_DIM, HIDDEN,
                                    compute_dtype=jnp.bfloat16)
    y_bf16 = jax.block_until_ready(
        accuracy_predictor_forward(x, kp_bf16, tile_b=256))
    assert y_bf16.shape == (B,)
    assert jnp.allclose(y_bf16, y_ref, atol=5e-2, rtol=5e-2)

    print("KERNEL_OK")
</pallas_src>

<mosaic_0001>
module attributes {stable_mosaic.version = 11 : i64} {
  func.func @_mlp_kernel(%arg0: i32, %arg1: memref<256x128xf32, #tpu.memory_space<vmem>>, %arg2: memref<128x128xf32, #tpu.memory_space<vmem>>, %arg3: memref<128x1xf32, #tpu.memory_space<vmem>>, %arg4: memref<128x128xf32, #tpu.memory_space<vmem>>, %arg5: memref<128x1xf32, #tpu.memory_space<vmem>>, %arg6: memref<128x128xf32, #tpu.memory_space<vmem>>, %arg7: memref<128x1xf32, #tpu.memory_space<vmem>>, %arg8: memref<128x1xf32, #tpu.memory_space<vmem>>, %arg9: memref<1x1xf32, #tpu.memory_space<vmem>>, %arg10: memref<1x256xf32, #tpu.memory_space<vmem>>) attributes {dimension_semantics = [#tpu.dimension_semantics<parallel>], iteration_bounds = array<i64: 1>, scalar_prefetch = 0 : i64, scratch_operands = 0 : i64, tpu.core_type = #tpu.core_type<tc>, window_params = [{transform_indices = @transform_0, window_bounds = array<i64: 256, 128>}, {pipeline_mode = #tpu.pipeline_mode<synchronous>, transform_indices = @transform_1, window_bounds = array<i64: 128, 128>}, {pipeline_mode = #tpu.pipeline_mode<synchronous>, transform_indices = @transform_2, window_bounds = array<i64: 128, 1>}, {pipeline_mode = #tpu.pipeline_mode<synchronous>, transform_indices = @transform_3, window_bounds = array<i64: 128, 128>}, {pipeline_mode = #tpu.pipeline_mode<synchronous>, transform_indices = @transform_4, window_bounds = array<i64: 128, 1>}, {pipeline_mode = #tpu.pipeline_mode<synchronous>, transform_indices = @transform_5, window_bounds = array<i64: 128, 128>}, {pipeline_mode = #tpu.pipeline_mode<synchronous>, transform_indices = @transform_6, window_bounds = array<i64: 128, 1>}, {pipeline_mode = #tpu.pipeline_mode<synchronous>, transform_indices = @transform_7, window_bounds = array<i64: 128, 1>}, {pipeline_mode = #tpu.pipeline_mode<synchronous>, transform_indices = @transform_8, window_bounds = array<i64: 1, 1>}, {transform_indices = @transform_9, window_bounds = array<i64: 1, 256>}]} {
    %c0 = arith.constant 0 : index
    %c0_0 = arith.constant 0 : index
    %0 = vector.load %arg2[%c0, %c0_0] : memref<128x128xf32, #tpu.memory_space<vmem>>, vector<128x128xf32>
    %c0_1 = arith.constant 0 : index
    %c0_2 = arith.constant 0 : index
    %1 = vector.load %arg1[%c0_1, %c0_2] : memref<256x128xf32, #tpu.memory_space<vmem>>, vector<256x128xf32>
    %cst = arith.constant dense<0.000000e+00> : vector<128x256xf32>
    %2 = tpu.matmul %0, %1, %cst {dimension_numbers = #tpu.dot_dimension_numbers<[1], [1], [0], [0], [0, 0, 1, 0], [], []>} : vector<128x128xf32>, vector<256x128xf32>, vector<128x256xf32> -> vector<128x256xf32>
    %c0_3 = arith.constant 0 : index
    %c0_4 = arith.constant 0 : index
    %3 = vector.load %arg3[%c0_3, %c0_4] : memref<128x1xf32, #tpu.memory_space<vmem>>, vector<128x1xf32>
    %4 = vector.broadcast %3 : vector<128x1xf32> to vector<128x256xf32>
    %5 = arith.addf %2, %4 : vector<128x256xf32>
    %cst_5 = arith.constant 0.000000e+00 : f32
    %6 = vector.broadcast %cst_5 : f32 to vector<128x256xf32>
    %7 = arith.maximumf %5, %6 : vector<128x256xf32>
    %c0_6 = arith.constant 0 : index
    %c0_7 = arith.constant 0 : index
    %8 = vector.load %arg4[%c0_6, %c0_7] : memref<128x128xf32, #tpu.memory_space<vmem>>, vector<128x128xf32>
    %cst_8 = arith.constant dense<0.000000e+00> : vector<128x256xf32>
    %9 = tpu.matmul %8, %7, %cst_8 {dimension_numbers = #tpu.dot_dimension_numbers<[1], [0], [0], [1], [0, 0, 1, 1], [], []>} : vector<128x128xf32>, vector<128x256xf32>, vector<128x256xf32> -> vector<128x256xf32>
    %c0_9 = arith.constant 0 : index
    %c0_10 = arith.constant 0 : index
    %10 = vector.load %arg5[%c0_9, %c0_10] : memref<128x1xf32, #tpu.memory_space<vmem>>, vector<128x1xf32>
    %11 = vector.broadcast %10 : vector<128x1xf32> to vector<128x256xf32>
    %12 = arith.addf %9, %11 : vector<128x256xf32>
    %cst_11 = arith.constant 0.000000e+00 : f32
    %13 = vector.broadcast %cst_11 : f32 to vector<128x256xf32>
    %14 = arith.maximumf %12, %13 : vector<128x256xf32>
    %c0_12 = arith.constant 0 : index
    %c0_13 = arith.constant 0 : index
    %15 = vector.load %arg6[%c0_12, %c0_13] : memref<128x128xf32, #tpu.memory_space<vmem>>, vector<128x128xf32>
    %cst_14 = arith.constant dense<0.000000e+00> : vector<128x256xf32>
    %16 = tpu.matmul %15, %14, %cst_14 {dimension_numbers = #tpu.dot_dimension_numbers<[1], [0], [0], [1], [0, 0, 1, 1], [], []>} : vector<128x128xf32>, vector<128x256xf32>, vector<128x256xf32> -> vector<128x256xf32>
    %c0_15 = arith.constant 0 : index
    %c0_16 = arith.constant 0 : index
    %17 = vector.load %arg7[%c0_15, %c0_16] : memref<128x1xf32, #tpu.memory_space<vmem>>, vector<128x1xf32>
    %18 = vector.broadcast %17 : vector<128x1xf32> to vector<128x256xf32>
    %19 = arith.addf %16, %18 : vector<128x256xf32>
    %cst_17 = arith.constant 0.000000e+00 : f32
    %20 = vector.broadcast %cst_17 : f32 to vector<128x256xf32>
    %21 = arith.maximumf %19, %20 : vector<128x256xf32>
    %c0_18 = arith.constant 0 : index
    %c0_19 = arith.constant 0 : index
    %22 = vector.load %arg8[%c0_18, %c0_19] : memref<128x1xf32, #tpu.memory_space<vmem>>, vector<128x1xf32>
    %23 = vector.broadcast %22 : vector<128x1xf32> to vector<128x256xf32>
    %24 = arith.mulf %21, %23 : vector<128x256xf32>
    %cst_20 = arith.constant dense<0.000000e+00> : vector<256xf32>
    %25 = vector.multi_reduction <add>, %24, %cst_20 [0] : vector<128x256xf32> to vector<256xf32>
    %26 = vector.shape_cast %25 : vector<256xf32> to vector<1x256xf32>
    %c0_21 = arith.constant 0 : index
    %c0_22 = arith.constant 0 : index
    %27 = vector.load %arg9[%c0_21, %c0_22] : memref<1x1xf32, #tpu.memory_space<vmem>>, vector<1x1xf32>
    %28 = vector.broadcast %27 : vector<1x1xf32> to vector<1x256xf32>
    %29 = arith.addf %26, %28 : vector<1x256xf32>
    %c0_23 = arith.constant 0 : index
    %c0_24 = arith.constant 0 : index
    %30 = vector.load %arg10[%c0_23, %c0_24] : memref<1x256xf32, #tpu.memory_space<vmem>>, vector<1x256xf32>
    tpu.vector_store %arg10[%c0_23, %c0_24], %29 {strides = array<i32>} : memref<1x256xf32, #tpu.memory_space<vmem>>, vector<1x256xf32>,
    return
  }
  func.func @transform_0(%arg0: i32) -> (i32, i32) {
    %c0_i32 = arith.constant 0 : i32
    %c0_i32_0 = arith.constant 0 : i32
    return %arg0, %c0_i32 : i32, i32
  }
  func.func @transform_1(%arg0: i32) -> (i32, i32) {
    %c0_i32 = arith.constant 0 : i32
    %c0_i32_0 = arith.constant 0 : i32
    %c0_i32_1 = arith.constant 0 : i32
    return %c0_i32, %c0_i32_0 : i32, i32
  }
  func.func @transform_2(%arg0: i32) -> (i32, i32) {
    %c0_i32 = arith.constant 0 : i32
    %c0_i32_0 = arith.constant 0 : i32
    %c0_i32_1 = arith.constant 0 : i32
    return %c0_i32, %c0_i32_0 : i32, i32
  }
  func.func @transform_3(%arg0: i32) -> (i32, i32) {
    %c0_i32 = arith.constant 0 : i32
    %c0_i32_0 = arith.constant 0 : i32
    %c0_i32_1 = arith.constant 0 : i32
    return %c0_i32, %c0_i32_0 : i32, i32
  }
  func.func @transform_4(%arg0: i32) -> (i32, i32) {
    %c0_i32 = arith.constant 0 : i32
    %c0_i32_0 = arith.constant 0 : i32
    %c0_i32_1 = arith.constant 0 : i32
    return %c0_i32, %c0_i32_0 : i32, i32
  }
  func.func @transform_5(%arg0: i32) -> (i32, i32) {
    %c0_i32 = arith.constant 0 : i32
    %c0_i32_0 = arith.constant 0 : i32
    %c0_i32_1 = arith.constant 0 : i32
    return %c0_i32, %c0_i32_0 : i32, i32
  }
  func.func @transform_6(%arg0: i32) -> (i32, i32) {
    %c0_i32 = arith.constant 0 : i32
    %c0_i32_0 = arith.constant 0 : i32
    %c0_i32_1 = arith.constant 0 : i32
    return %c0_i32, %c0_i32_0 : i32, i32
  }
  func.func @transform_7(%arg0: i32) -> (i32, i32) {
    %c0_i32 = arith.constant 0 : i32
    %c0_i32_0 = arith.constant 0 : i32
    %c0_i32_1 = arith.constant 0 : i32
    return %c0_i32, %c0_i32_0 : i32, i32
  }
  func.func @transform_8(%arg0: i32) -> (i32, i32) {
    %c0_i32 = arith.constant 0 : i32
    %c0_i32_0 = arith.constant 0 : i32
    %c0_i32_1 = arith.constant 0 : i32
    return %c0_i32, %c0_i32_0 : i32, i32
  }
  func.func @transform_9(%arg0: i32) -> (i32, i32) {
    %c0_i32 = arith.constant 0 : i32
    %c0_i32_0 = arith.constant 0 : i32
    return %c0_i32, %arg0 : i32, i32
  }
}

</mosaic_0001>

<bundles_post_ra>
// kernel: tpu_custom_call.1
= control target key start
LH: loop header
LB: loop body
LE: loop exit
PB: predicated region body
PF: predicated region fallthrough
CT: control target
= control target key end

     0   :  { %s1965_s0 = inlined_call_operand.vmem [shape: f32[256,128], index: 0, kind: input, shape index: {}]   ;;  %s1966_s1 = inlined_call_operand.vmem [shape: f32[128,128], index: 1, kind: input, shape index: {}]   ;;  %s1967_s2 = inlined_call_operand.vmem [shape: f32[128,1], index: 2, kind: input, shape index: {}]   ;;  %s1968_s3 = inlined_call_operand.vmem [shape: f32[128,128], index: 3, kind: input, shape index: {}]   ;;  %s1969_s4 = inlined_call_operand.vmem [shape: f32[128,1], index: 4, kind: input, shape index: {}]   ;;  %s1970_s5 = inlined_call_operand.hbm [shape: f32[128,128], index: 5, kind: input, shape index: {}]   ;;  %s1971_s6 = inlined_call_operand.vmem [shape: f32[128,1], index: 6, kind: input, shape index: {}]   ;;  %s1972_s7 = inlined_call_operand.vmem [shape: f32[128,1], index: 7, kind: input, shape index: {}]   ;;  %s1973_s8 = inlined_call_operand.<no memory space> [shape: f32[1,1], index: 8, kind: input, shape index: {}]   ;;  %s1974_s9 = inlined_call_operand.hbm [shape: f32[1,256], index: 9, kind: output, shape index: {}]  }
   0x1   :  { %v14_v0 = vstv %s1973_s8 }
   0x2   :  { %15 = vst [vmem:[#allocation2] sm:$0x1] %v14_v0 }
   0x3   :  { %16 = vsyncpa [#allocation4], 0 }
   0x4   :  { %17 = vsyncpa [#allocation5], 0  ;;  %s1449_s11 = smov [#allocation3]   ;;  %s1401_s15 = scalar_lea.hbm %s1970_s5, 2048 }
   0x5   :  { %s33_s12 = sshll.u32 %s1449_s11, 4  ;;  %p1402_p0 = scmp.ne.s32.totalorder %s1970_s5, %s1401_s15  ;;  %s34_s12 = int_to_ptr.vmem [resolvable:$true] %s33_s12 }
   0x6   :  { %p1405_p1 = scmp.lt.u32.totalorder %s1401_s15, %s1970_s5 }
   0x8   :  { %p1407_p2 = pnand %p1405_p1, %p1402_p0 }
   0xa   :  { %1410 = shalt.err (!%p1407_p2)
}
   0xb   :  { %s1411_s8 = scalar_lea.vmem %s34_s12, 2048  ;;  %p1416_p4 = scmp.lt.s32.totalorder %s34_s12, %s34_s12 }
   0xc   :  { %p1412_p3 = scmp.ne.s32.totalorder %s34_s12, %s1411_s8  ;;  %p1417_p5 = scmp.lt.s32.totalorder %s1411_s8, %s1411_s8 }
   0xe   :  { %p1418_p6 = por %p1417_p5, %p1416_p4 }
  0x10   :  { %p1419_p7 = pnand %p1418_p6, %p1412_p3 }
  0x12   :  { %1422 = shalt.err (!%p1419_p7)
}
  0x13   :  { %s1450_s20 = smov 128   ;;  %s1451_s21 = smov 8  }
  0x14   :  { %39 = dma.hbm_to_vmem [thread:$0]  %s1970_s5, 2048, %s34_s12, [#allocation4], %s1450_s20, %s1450_s20, %s1451_s21  }
  0x15   :  { %1445 = dma.done.wait [#allocation4], 2048  }
  0x16   :  { %1446 = vsyncadd [#allocation4], 4294965248  ;;  %v1452_v1 = vmov 0   ;;  %v81_v2 = vld [vmem:[%s1965_s0 + $0x80] sm:$0xff]  ;;  %v82_v3 = vld [vmem:[%s1965_s0 + $0x88] sm:$0xff] }
  0x17   :  { %1399 = vset.pattern.permute.xlu0 %v1452_v1  ;;  %1400 = vset.pattern.permute.xlu1 %v1452_v1  ;;  %v65_v4 = vld [vmem:[%s1965_s0] sm:$0xff]  ;;  %v1280_v5 = vpack.c.bf16 %v82_v3, %v81_v2  ;;  %v66_v6 = vld [vmem:[%s1965_s0 + $0x8] sm:$0xff]  ;;  %v83_v7 = vld [vmem:[%s1965_s0 + $0x90] sm:$0xff] }
  0x18   :  { %v84_v8 = vld [vmem:[%s1965_s0 + $0x98] sm:$0xff]  ;;  %v1282_v9 = vpack.c.bf16 %v66_v6, %v65_v4  ;;  %v67_v11 = vld [vmem:[%s1965_s0 + $0x10] sm:$0xff]  ;;  %v97_v13 = vld [vmem:[%s1967_s2] sm:$0xff] }
  0x19   :  { %v1284_v10 = vpack.c.bf16 %v84_v8, %v83_v7  ;;  %1281 = vmatprep.subr.bf16.mxu0 %v1280_v5  ;;  %v68_v12 = vld [vmem:[%s1965_s0 + $0x18] sm:$0xff]  ;;  %v85_v14 = vld [vmem:[%s1965_s0 + $0xa0] sm:$0xff]  ;;  %v86_v15 = vld [vmem:[%s1965_s0 + $0xa8] sm:$0xff]  ;;  %115 = vperm.xlu0 %1399, %v97_v13  }
  0x1a   :  { %1283 = vmatpush3.bf16.xpose.msra.mxu0 %v1282_v9  ;;  %v98_v16 = vld [vmem:[%s1967_s2 + $0x8] sm:$0xff]  ;;  %v1286_v17 = vpack.c.bf16 %v68_v12, %v67_v11  ;;  %v1288_v18 = vpack.c.bf16 %v86_v15, %v85_v14  ;;  %v99_v19 = vld [vmem:[%s1967_s2 + $0x10] sm:$0xff]  ;;  %v101_v20 = vld [vmem:[%s1967_s2 + $0x20] sm:$0xff] }
  0x1b   :  { %1285 = vmatprep.subr.bf16.mxu0 %v1284_v10  ;;  %125 = vperm.xlu1 %1400, %v99_v19   ;;  %v100_v21 = vld [vmem:[%s1967_s2 + $0x18] sm:$0xff]  ;;  %v69_v22 = vld [vmem:[%s1965_s0 + $0x20] sm:$0xff]  ;;  %v70_v23 = vld [vmem:[%s1965_s0 + $0x28] sm:$0xff] }
  0x1c   :  { %v87_v24 = vld [vmem:[%s1965_s0 + $0xb0] sm:$0xff]  ;;  %v88_v25 = vld [vmem:[%s1965_s0 + $0xb8] sm:$0xff]  ;;  %v102_v27 = vld [vmem:[%s1967_s2 + $0x28] sm:$0xff]  ;;  %v1290_v29 = vpack.c.bf16 %v70_v23, %v69_v22 }
  0x1d   :  { %120 = vperm.xlu0 %1399, %v98_v16   ;;  %v103_v26 = vld [vmem:[%s1967_s2 + $0x30] sm:$0xff]  ;;  %v1587_v28 = vld [vmem:[%s1966_s1] sm:$0xff]  ;;  %v1292_v30 = vpack.c.bf16 %v88_v25, %v87_v24  ;;  %v104_v32 = vld [vmem:[%s1967_s2 + $0x38] sm:$0xff] }
  0x1e   :  { %1248 = vmatprep.mubr.f32.mxu0 %v1587_v28  ;;  %v105_v31 = vld [vmem:[%s1967_s2 + $0x40] sm:$0xff]  ;;  %v71_v33 = vld [vmem:[%s1965_s0 + $0x30] sm:$0xff]  ;;  %v72_v34 = vld [vmem:[%s1965_s0 + $0x38] sm:$0xff] }
  0x1f   :  { %130 = vperm.xlu1 %1400, %v100_v21   ;;  %v89_v35 = vld [vmem:[%s1965_s0 + $0xc0] sm:$0xff]  ;;  %v90_v36 = vld [vmem:[%s1965_s0 + $0xc8] sm:$0xff]  ;;  %v107_v37 = vld [vmem:[%s1967_s2 + $0x50] sm:$0xff]  ;;  %v1294_v39 = vpack.c.bf16 %v72_v34, %v71_v33 }
  0x20   :  { %v106_v38 = vld [vmem:[%s1967_s2 + $0x48] sm:$0xff]  ;;  %v1296_v40 = vpack.c.bf16 %v90_v36, %v89_v35  ;;  %v109_v41 = vld [vmem:[%s1967_s2 + $0x60] sm:$0xff]  ;;  %v108_v42 = vld [vmem:[%s1967_s2 + $0x58] sm:$0xff] }
  0x21   :  { %135 = vperm.xlu0 %1399, %v101_v20   ;;  %v73_v43 = vld [vmem:[%s1965_s0 + $0x40] sm:$0xff]  ;;  %v74_v44 = vld [vmem:[%s1965_s0 + $0x48] sm:$0xff]  ;;  %v91_v45 = vld [vmem:[%s1965_s0 + $0xd0] sm:$0xff] }
  0x22   :  { %1287 = vmatpush3.bf16.xpose.msra.mxu0 %v1286_v17  ;;  %v92_v46 = vld [vmem:[%s1965_s0 + $0xd8] sm:$0xff]  ;;  %v111_v47 = vld [vmem:[%s1967_s2 + $0x70] sm:$0xff]  ;;  %v110_v48 = vld [vmem:[%s1967_s2 + $0x68] sm:$0xff]  ;;  %v1298_v49 = vpack.c.bf16 %v74_v44, %v73_v43 }
  0x23   :  { %1289 = vmatprep.subr.bf16.mxu0 %v1288_v18  ;;  %140 = vperm.xlu1 %1400, %v102_v27   ;;  %v1300_v50 = vpack.c.bf16 %v92_v46, %v91_v45  ;;  %v402_v51 = vld [vmem:[%s1969_s4] sm:$0xff]  ;;  %v112_v52 = vld [vmem:[%s1967_s2 + $0x78] sm:$0xff]  ;;  %v75_v53 = vld [vmem:[%s1965_s0 + $0x50] sm:$0xff] }
  0x24   :  { %v76_v54 = vld [vmem:[%s1965_s0 + $0x58] sm:$0xff]  ;;  %v93_v55 = vld [vmem:[%s1965_s0 + $0xe0] sm:$0xff]  ;;  %v94_v56 = vld [vmem:[%s1965_s0 + $0xe8] sm:$0xff] }
  0x25   :  { %145 = vperm.xlu0 %1399, %v103_v26   ;;  %v404_v57 = vld [vmem:[%s1969_s4 + $0x10] sm:$0xff]  ;;  %v403_v58 = vld [vmem:[%s1969_s4 + $0x8] sm:$0xff]  ;;  %v1302_v59 = vpack.c.bf16 %v76_v54, %v75_v53  ;;  %v1304_v60 = vpack.c.bf16 %v94_v56, %v93_v55  ;;  %v406_v61 = vld [vmem:[%s1969_s4 + $0x20] sm:$0xff] }
  0x26   :  { %v405_v62 = vld [vmem:[%s1969_s4 + $0x18] sm:$0xff]  ;;  %v77_v63 = vld [vmem:[%s1965_s0 + $0x60] sm:$0xff]  ;;  %v78_v0 = vld [vmem:[%s1965_s0 + $0x68] sm:$0xff] }
  0x27   :  { %150 = vperm.xlu1 %1400, %v104_v32   ;;  %v95_v1 = vld [vmem:[%s1965_s0 + $0xf0] sm:$0xff]  ;;  %v96_v2 = vld [vmem:[%s1965_s0 + $0xf8] sm:$0xff]  ;;  %v407_v4 = vld [vmem:[%s1969_s4 + $0x28] sm:$0xff]  ;;  %v1306_v5 = vpack.c.bf16 %v78_v0, %v77_v63 }
  0x28   :  { %v408_v3 = vld [vmem:[%s1969_s4 + $0x30] sm:$0xff]  ;;  %v1308_v6 = vpack.c.bf16 %v96_v2, %v95_v1  ;;  %v410_v7 = vld [vmem:[%s1969_s4 + $0x40] sm:$0xff]  ;;  %v409_v8 = vld [vmem:[%s1969_s4 + $0x38] sm:$0xff] }
  0x29   :  { %155 = vperm.xlu0 %1399, %v105_v31   ;;  %v79_v9 = vld [vmem:[%s1965_s0 + $0x70] sm:$0xff]  ;;  %v80_v10 = vld [vmem:[%s1965_s0 + $0x78] sm:$0xff]  ;;  %v411_v12 = vld [vmem:[%s1969_s4 + $0x48] sm:$0xff] }
  0x2a   :  { %1291 = vmatpush3.bf16.xpose.msra.mxu0 %v1290_v29  ;;  %v412_v11 = vld [vmem:[%s1969_s4 + $0x50] sm:$0xff]  ;;  %v1310_v13 = vpack.c.bf16 %v80_v10, %v79_v9  ;;  %v414_v14 = vld [vmem:[%s1969_s4 + $0x60] sm:$0xff]  ;;  %v413_v15 = vld [vmem:[%s1969_s4 + $0x58] sm:$0xff] }
  0x2b   :  { %1293 = vmatprep.subr.bf16.mxu0 %v1292_v30  ;;  %160 = vperm.xlu1 %1400, %v106_v38   ;;  %v416_v16 = vld [vmem:[%s1969_s4 + $0x70] sm:$0xff]  ;;  %v415_v17 = vld [vmem:[%s1969_s4 + $0x68] sm:$0xff]  ;;  %v707_v19 = vld [vmem:[%s1971_s6] sm:$0xff] }
  0x2c   :  { %v50_v18 = vld [vmem:[%s1966_s1 + $0x8] sm:$0xff]  ;;  %v417_v20 = vld [vmem:[%s1969_s4 + $0x78] sm:$0xff]  ;;  %v51_v21 = vld [vmem:[%s1966_s1 + $0x10] sm:$0xff] }
  0x2d   :  { %165 = vperm.xlu0 %1399, %v107_v37   ;;  %v709_v22 = vld [vmem:[%s1971_s6 + $0x10] sm:$0xff]  ;;  %v708_v23 = vld [vmem:[%s1971_s6 + $0x8] sm:$0xff]  ;;  %v52_v24 = vld [vmem:[%s1966_s1 + $0x18] sm:$0xff] }
  0x2e   :  { %v996_v25 = vld [vmem:[%s1972_s7] sm:$0xff]  ;;  %v710_v26 = vld [vmem:[%s1971_s6 + $0x18] sm:$0xff]  ;;  %v997_v29 = vld [vmem:[%s1972_s7 + $0x8] sm:$0xff] }
  0x2f   :  { %170 = vperm.xlu1 %1400, %v108_v42   ;;  %v53_v27 = vld [vmem:[%s1966_s1 + $0x20] sm:$0xff]  ;;  %v54_v30 = vld [vmem:[%s1966_s1 + $0x28] sm:$0xff]  ;;  %v998_v32 = vld [vmem:[%s1972_s7 + $0x10] sm:$0xff] }
  0x30   :  { %v712_v31 = vld [vmem:[%s1971_s6 + $0x28] sm:$0xff]  ;;  %v55_v33 = vld [vmem:[%s1966_s1 + $0x30] sm:$0xff]  ;;  %v999_v35 = vld [vmem:[%s1972_s7 + $0x18] sm:$0xff] }
  0x31   :  { %175 = vperm.xlu0 %1399, %v109_v41   ;;  %v713_v34 = vld [vmem:[%s1971_s6 + $0x30] sm:$0xff]  ;;  %v56_v36 = vld [vmem:[%s1966_s1 + $0x38] sm:$0xff]  ;;  %v1000_v38 = vld [vmem:[%s1972_s7 + $0x20] sm:$0xff] }
  0x32   :  { %1295 = vmatpush3.bf16.xpose.msra.mxu0 %v1294_v39  ;;  %v714_v37 = vld [vmem:[%s1971_s6 + $0x38] sm:$0xff]  ;;  %v57_v39 = vld [vmem:[%s1966_s1 + $0x40] sm:$0xff]  ;;  %v1001_v41 = vld [vmem:[%s1972_s7 + $0x28] sm:$0xff] }
  0x33   :  { %1297 = vmatprep.subr.bf16.mxu0 %v1296_v40  ;;  %180 = vperm.xlu1 %1400, %v110_v48   ;;  %v715_v40 = vld [vmem:[%s1971_s6 + $0x40] sm:$0xff]  ;;  %v58_v42 = vld [vmem:[%s1966_s1 + $0x48] sm:$0xff]  ;;  %v1002_v44 = vld [vmem:[%s1972_s7 + $0x30] sm:$0xff] }
  0x34   :  { %v716_v43 = vld [vmem:[%s1971_s6 + $0x48] sm:$0xff]  ;;  %v59_v45 = vld [vmem:[%s1966_s1 + $0x50] sm:$0xff]  ;;  %v60_v48 = vld [vmem:[%s1966_s1 + $0x58] sm:$0xff] }
  0x35   :  { %185 = vperm.xlu0 %1399, %v111_v47   ;;  %v717_v46 = vld [vmem:[%s1971_s6 + $0x50] sm:$0xff]  ;;  %v1003_v47 = vld [vmem:[%s1972_s7 + $0x38] sm:$0xff]  ;;  %v1005_v53 = vld [vmem:[%s1972_s7 + $0x48] sm:$0xff] }
  0x36   :  { %v62_v54 = vld [vmem:[%s1966_s1 + $0x68] sm:$0xff]  ;;  %v1006_v56 = vld [vmem:[%s1972_s7 + $0x50] sm:$0xff]  ;;  %v1166_v1 = vld [vmem:[#allocation2] sm:$0x1] }
  0x37   :  { %190 = vperm.xlu1 %1400, %v112_v52   ;;  %v719_v52 = vld [vmem:[%s1971_s6 + $0x60] sm:$0xff]  ;;  %v720_v55 = vld [vmem:[%s1971_s6 + $0x68] sm:$0xff]  ;;  %v1010_v63 = vld [vmem:[%s1972_s7 + $0x70] sm:$0xff] }
  0x38   :  { %v1009_v0 = vld [vmem:[%s1972_s7 + $0x68] sm:$0xff]  ;;  %v1011_v2 = vld [vmem:[%s1972_s7 + $0x78] sm:$0xff] }
  0x39   :  { %420 = vperm.xlu0 %1399, %v402_v51   ;;  %v61_v51 = vld [vmem:[%s1966_s1 + $0x60] sm:$0xff] }
  0x3a   :  { %1299 = vmatpush3.bf16.xpose.msra.mxu0 %v1298_v49  ;;  %v718_v49 = vld [vmem:[%s1971_s6 + $0x58] sm:$0xff] }
  0x3b   :  { %1301 = vmatprep.subr.bf16.mxu0 %v1300_v50  ;;  %425 = vperm.xlu1 %1400, %v403_v58   ;;  %v1004_v50 = vld [vmem:[%s1972_s7 + $0x40] sm:$0xff]  ;;  %v721_v58 = vld [vmem:[%s1971_s6 + $0x70] sm:$0xff] }
  0x3d   :  { %430 = vperm.xlu0 %1399, %v404_v57   ;;  %v63_v57 = vld [vmem:[%s1966_s1 + $0x70] sm:$0xff] }
  0x3f   :  { %435 = vperm.xlu1 %1400, %v405_v62   ;;  %v1008_v62 = vld [vmem:[%s1972_s7 + $0x60] sm:$0xff] }
  0x41   :  { %440 = vperm.xlu0 %1399, %v406_v61   ;;  %v722_v61 = vld [vmem:[%s1971_s6 + $0x78] sm:$0xff] }
  0x42   :  { %1303 = vmatpush3.bf16.xpose.msra.mxu0 %v1302_v59  ;;  %v1007_v59 = vld [vmem:[%s1972_s7 + $0x58] sm:$0xff] }
  0x43   :  { %1305 = vmatprep.subr.bf16.mxu0 %v1304_v60  ;;  %445 = vperm.xlu1 %1400, %v407_v4   ;;  %v64_v60 = vld [vmem:[%s1966_s1 + $0x78] sm:$0xff] }
  0x45   :  { %450 = vperm.xlu0 %1399, %v408_v3   ;;  %v1453_v3 = vmov 0.0  }
  0x46   :  { %586 = vmatprep.mubr.f32.mxu1 %v1453_v3 }
  0x47   :  { %455 = vperm.xlu1 %1400, %v409_v8  }
  0x49   :  { %460 = vperm.xlu0 %1399, %v410_v7  }
  0x4a   :  { %1307 = vmatpush3.bf16.xpose.msra.mxu0 %v1306_v5 }
  0x4b   :  { %1309 = vmatprep.subr.bf16.mxu0 %v1308_v6  ;;  %465 = vperm.xlu1 %1400, %v411_v12  }
  0x4d   :  { %470 = vperm.xlu0 %1399, %v412_v11  }
  0x4f   :  { %475 = vperm.xlu1 %1400, %v413_v15  }
  0x51   :  { %480 = vperm.xlu0 %1399, %v414_v14  }
  0x52   :  { %1311 = vmatpush3.bf16.xpose.msra.mxu0 %v1310_v13 }
  0x53   :  { %485 = vperm.xlu1 %1400, %v415_v17  }
  0x55   :  { %490 = vperm.xlu0 %1399, %v416_v16  }
  0x57   :  { %495 = vperm.xlu1 %1400, %v417_v20  }
  0x59   :  { %1249 = vmatmul.mubr.f32.vlgmr.msra.gmra.mrb[0].mxu0 %v1587_v28  ;;  %725 = vperm.xlu0 %1399, %v707_v19   ;;  %v711_v28 = vld [vmem:[%s1971_s6 + $0x20] sm:$0xff] }
  0x5a   :  { %1250 = vmatprep.mubr.f32.mxu0 %v50_v18 }
  0x5b   :  { %730 = vperm.xlu1 %1400, %v708_v23  }
  0x5d   :  { %1251 = vmatmul.mubr.f32.gmra.mrb[2].mxu0 %v50_v18  ;;  %735 = vperm.xlu0 %1399, %v709_v22  }
  0x5e   :  { %1252 = vmatprep.mubr.f32.mxu0 %v51_v21 }
  0x5f   :  { %740 = vperm.xlu1 %1400, %v710_v26  }
  0x61   :  { %1253 = vmatmul.mubr.f32.gmra.mrb[4].mxu0 %v51_v21  ;;  %1014 = vperm.xlu0 %1399, %v996_v25  }
  0x62   :  { %1254 = vmatprep.mubr.f32.mxu0 %v52_v24 }
  0x63   :  { %1019 = vperm.xlu1 %1400, %v997_v29  }
  0x65   :  { %1255 = vmatmul.mubr.f32.gmra.mrb[6].mxu0 %v52_v24  ;;  %745 = vperm.xlu0 %1399, %v711_v28  }
  0x66   :  { %1256 = vmatprep.mubr.f32.mxu0 %v53_v27 }
  0x67   :  { %1024 = vperm.xlu1 %1400, %v998_v32  }
  0x69   :  { %1257 = vmatmul.mubr.f32.gmra.mrb[8].mxu0 %v53_v27  ;;  %750 = vperm.xlu0 %1399, %v712_v31  }
  0x6a   :  { %1258 = vmatprep.mubr.f32.mxu0 %v54_v30 }
  0x6b   :  { %1029 = vperm.xlu1 %1400, %v999_v35  }
  0x6d   :  { %1259 = vmatmul.mubr.f32.gmra.mrb[10].mxu0 %v54_v30  ;;  %755 = vperm.xlu0 %1399, %v713_v34  }
  0x6e   :  { %1260 = vmatprep.mubr.f32.mxu0 %v55_v33 }
  0x6f   :  { %1034 = vperm.xlu1 %1400, %v1000_v38  }
  0x71   :  { %1261 = vmatmul.mubr.f32.gmra.mrb[12].mxu0 %v55_v33  ;;  %760 = vperm.xlu0 %1399, %v714_v37  }
  0x72   :  { %1262 = vmatprep.mubr.f32.mxu0 %v56_v36 }
  0x73   :  { %1039 = vperm.xlu1 %1400, %v1001_v41  }
  0x75   :  { %1263 = vmatmul.mubr.f32.gmra.mrb[14].mxu0 %v56_v36  ;;  %765 = vperm.xlu0 %1399, %v715_v40  }
  0x76   :  { %1264 = vmatprep.mubr.f32.mxu0 %v57_v39 }
  0x77   :  { %1044 = vperm.xlu1 %1400, %v1002_v44  }
  0x79   :  { %1265 = vmatmul.mubr.f32.gmra.mrb[16].mxu0 %v57_v39  ;;  %770 = vperm.xlu0 %1399, %v716_v43  }
  0x7a   :  { %1266 = vmatprep.mubr.f32.mxu0 %v58_v42 }
  0x7b   :  { %1049 = vperm.xlu1 %1400, %v1003_v47  }
  0x7d   :  { %1267 = vmatmul.mubr.f32.gmra.mrb[18].mxu0 %v58_v42  ;;  %775 = vperm.xlu0 %1399, %v717_v46  }
  0x7e   :  { %1268 = vmatprep.mubr.f32.mxu0 %v59_v45 }
  0x7f   :  { %1054 = vperm.xlu1 %1400, %v1004_v50  }
  0x81   :  { %1269 = vmatmul.mubr.f32.gmra.mrb[20].mxu0 %v59_v45  ;;  %780 = vperm.xlu0 %1399, %v718_v49  }
  0x82   :  { %1270 = vmatprep.mubr.f32.mxu0 %v60_v48 }
  0x83   :  { %1059 = vperm.xlu1 %1400, %v1005_v53  }
  0x85   :  { %1271 = vmatmul.mubr.f32.gmra.mrb[22].mxu0 %v60_v48  ;;  %785 = vperm.xlu0 %1399, %v719_v52  }
  0x86   :  { %1272 = vmatprep.mubr.f32.mxu0 %v61_v51 }
  0x87   :  { %1064 = vperm.xlu1 %1400, %v1006_v56  }
  0x89   :  { %1273 = vmatmul.mubr.f32.gmra.mrb[24].mxu0 %v61_v51  ;;  %790 = vperm.xlu0 %1399, %v720_v55  }
  0x8a   :  { %1274 = vmatprep.mubr.f32.mxu0 %v62_v54 }
  0x8b   :  { %1069 = vperm.xlu1 %1400, %v1007_v59  }
  0x8d   :  { %1275 = vmatmul.mubr.f32.gmra.mrb[26].mxu0 %v62_v54  ;;  %795 = vperm.xlu0 %1399, %v721_v58  }
  0x8e   :  { %1276 = vmatprep.mubr.f32.mxu0 %v63_v57 }
  0x8f   :  { %1074 = vperm.xlu1 %1400, %v1008_v62  }
  0x91   :  { %1277 = vmatmul.mubr.f32.gmra.mrb[28].mxu0 %v63_v57  ;;  %800 = vperm.xlu0 %1399, %v722_v61  }
  0x92   :  { %1278 = vmatprep.mubr.f32.mxu0 %v64_v60 }
  0x93   :  { %1079 = vperm.xlu1 %1400, %v1009_v0  }
  0x95   :  { %1279 = vmatmul.mubr.f32.gmra.mrb[30].mxu0 %v64_v60  ;;  %1084 = vperm.xlu0 %1399, %v1010_v63  }
  0x96   :  { %562 = vmatprep.mubr.f32.mxu0 %v1453_v3 }
  0x97   :  { %1089 = vperm.xlu1 %1400, %v1011_v2  }
  0x98   :  { %v116_v4 = vpop.permute.xlu0 %115 }
  0x99   :  { %1169 = vperm.xlu0 %1399, %v1166_v1  }
  0x9a   :  { %v126_v13 = vpop.permute.xlu1 %125 }
  0x9c   :  { %v121_v8 = vpop.permute.xlu0 %120 }
  0x9e   :  { %v131_v24 = vpop.permute.xlu1 %130 }
  0xa0   :  { %v136_v37 = vpop.permute.xlu0 %135 }
  0xa2   :  { %v141_v40 = vpop.permute.xlu1 %140 }
  0xa4   :  { %v146_v53 = vpop.permute.xlu0 %145 }
  0xa6   :  { %v151_v56 = vpop.permute.xlu1 %150 }
 0x12c   :  { %v259_v5 = vpop.f32.mrb[0].mxu0 }
 0x12d   :  { %v261_v6 = vpop.f32.mrb[1].mxu0  ;;  %v260_v7 = vadd.f32 %v259_v5, %v116_v4 }
 0x12e   :  { %v262_v9 = vadd.f32 %v261_v6, %v116_v4  ;;  %v156_v6 = vpop.permute.xlu0 %155 }
 0x12f   :  { %v354_v15 = vmax.f32 %v260_v7, 0.0 }
 0x130   :  { %v265_v10 = vpop.f32.mrb[2].mxu0  ;;  %v355_v17 = vmax.f32 %v262_v9, 0.0  ;;  %v161_v9 = vpop.permute.xlu1 %160 }
 0x131   :  { %v266_v11 = vadd.f32 %v265_v10, %v121_v8  ;;  %v267_v12 = vpop.f32.mrb[3].mxu0 }
 0x132   :  { %v268_v14 = vadd.f32 %v267_v12, %v121_v8 }
 0x133   :  { %v356_v16 = vmax.f32 %v266_v11, 0.0 }
 0x134   :  { %v357_v18 = vmax.f32 %v268_v14, 0.0  ;;  %v271_v19 = vpop.f32.mrb[4].mxu0 }
 0x135   :  { %v1314_v20 = vpack.c.bf16 %v356_v16, %v354_v15  ;;  %v273_v21 = vpop.f32.mrb[5].mxu0  ;;  %v272_v23 = vadd.f32 %v271_v19, %v126_v13 }
 0x136   :  { %v1312_v22 = vpack.c.bf16 %v357_v18, %v355_v17  ;;  %v274_v25 = vadd.f32 %v273_v21, %v126_v13 }
 0x137   :  { %v358_v30 = vmax.f32 %v272_v23, 0.0 }
 0x138   :  { %v277_v26 = vpop.f32.mrb[6].mxu0  ;;  %1313 = vmatprep.subr.bf16.mxu0 %v1312_v22  ;;  %1376 = vmatprep.subr.bf16.mxu1 %v1312_v22  ;;  %v359_v32 = vmax.f32 %v274_v25, 0.0  ;;  %v166_v22 = vpop.permute.xlu0 %165 }
 0x139   :  { %v278_v27 = vadd.f32 %v277_v26, %v131_v24  ;;  %v279_v28 = vpop.f32.mrb[7].mxu0  ;;  %1315 = vmatpush1.bf16.msra.mxu0 %v1314_v20  ;;  %1384 = vmatpush1.bf16.msra.mxu1 %v1314_v20  ;;  %v171_v25 = vpop.permute.xlu1 %170 }
 0x13a   :  { %v280_v29 = vadd.f32 %v279_v28, %v131_v24 }
 0x13b   :  { %v360_v31 = vmax.f32 %v278_v27, 0.0 }
 0x13c   :  { %v361_v33 = vmax.f32 %v280_v29, 0.0  ;;  %v283_v34 = vpop.f32.mrb[8].mxu0 }
 0x13d   :  { %v1318_v35 = vpack.c.bf16 %v360_v31, %v358_v30  ;;  %v285_v36 = vpop.f32.mrb[9].mxu0  ;;  %v284_v39 = vadd.f32 %v283_v34, %v136_v37 }
 0x13e   :  { %v1316_v38 = vpack.c.bf16 %v361_v33, %v359_v32  ;;  %v286_v41 = vadd.f32 %v285_v36, %v136_v37 }
 0x13f   :  { %v362_v46 = vmax.f32 %v284_v39, 0.0 }
 0x140   :  { %v289_v42 = vpop.f32.mrb[10].mxu0  ;;  %1317 = vmatprep.subr.bf16.mxu0 %v1316_v38  ;;  %1377 = vmatprep.subr.bf16.mxu1 %v1316_v38  ;;  %v363_v48 = vmax.f32 %v286_v41, 0.0  ;;  %v176_v38 = vpop.permute.xlu0 %175 }
 0x141   :  { %v290_v43 = vadd.f32 %v289_v42, %v141_v40  ;;  %v291_v44 = vpop.f32.mrb[11].mxu0  ;;  %1319 = vmatpush1.bf16.msra.mxu0 %v1318_v35  ;;  %1385 = vmatpush1.bf16.msra.mxu1 %v1318_v35  ;;  %v181_v41 = vpop.permute.xlu1 %180 }
 0x142   :  { %v292_v45 = vadd.f32 %v291_v44, %v141_v40 }
 0x143   :  { %v364_v47 = vmax.f32 %v290_v43, 0.0 }
 0x144   :  { %v365_v49 = vmax.f32 %v292_v45, 0.0  ;;  %v295_v50 = vpop.f32.mrb[12].mxu0 }
 0x145   :  { %v1322_v51 = vpack.c.bf16 %v364_v47, %v362_v46  ;;  %v297_v52 = vpop.f32.mrb[13].mxu0  ;;  %v296_v55 = vadd.f32 %v295_v50, %v146_v53 }
 0x146   :  { %v1320_v54 = vpack.c.bf16 %v365_v49, %v363_v48  ;;  %v298_v57 = vadd.f32 %v297_v52, %v146_v53 }
 0x147   :  { %v366_v62 = vmax.f32 %v296_v55, 0.0 }
 0x148   :  { %v301_v58 = vpop.f32.mrb[14].mxu0  ;;  %1321 = vmatprep.subr.bf16.mxu0 %v1320_v54  ;;  %1378 = vmatprep.subr.bf16.mxu1 %v1320_v54  ;;  %v367_v0 = vmax.f32 %v298_v57, 0.0  ;;  %v186_v54 = vpop.permute.xlu0 %185 }
 0x149   :  { %v302_v59 = vadd.f32 %v301_v58, %v151_v56  ;;  %v303_v60 = vpop.f32.mrb[15].mxu0  ;;  %1323 = vmatpush1.bf16.msra.mxu0 %v1322_v51  ;;  %1386 = vmatpush1.bf16.msra.mxu1 %v1322_v51  ;;  %v191_v57 = vpop.permute.xlu1 %190 }
 0x14a   :  { %v304_v61 = vadd.f32 %v303_v60, %v151_v56 }
 0x14b   :  { %v368_v63 = vmax.f32 %v302_v59, 0.0 }
 0x14c   :  { %v369_v1 = vmax.f32 %v304_v61, 0.0  ;;  %v307_v2 = vpop.f32.mrb[16].mxu0 }
 0x14d   :  { %v1326_v4 = vpack.c.bf16 %v368_v63, %v366_v62  ;;  %v309_v5 = vpop.f32.mrb[17].mxu0  ;;  %v308_v8 = vadd.f32 %v307_v2, %v156_v6 }
 0x14e   :  { %v1324_v7 = vpack.c.bf16 %v369_v1, %v367_v0  ;;  %v310_v10 = vadd.f32 %v309_v5, %v156_v6  ;;  %v386_v6 = vld [vmem:[%s1968_s3] sm:$0xff] }
 0x14f   :  { %v370_v15 = vmax.f32 %v308_v8, 0.0  ;;  %v387_v8 = vld [vmem:[%s1968_s3 + $0x8] sm:$0xff] }
 0x150   :  { %v313_v11 = vpop.f32.mrb[18].mxu0  ;;  %1325 = vmatprep.subr.bf16.mxu0 %v1324_v7  ;;  %1379 = vmatprep.subr.bf16.mxu1 %v1324_v7  ;;  %v371_v17 = vmax.f32 %v310_v10, 0.0  ;;  %v390_v7 = vld [vmem:[%s1968_s3 + $0x20] sm:$0xff]  ;;  %v388_v10 = vld [vmem:[%s1968_s3 + $0x10] sm:$0xff] }
 0x151   :  { %v314_v12 = vadd.f32 %v313_v11, %v161_v9  ;;  %v315_v13 = vpop.f32.mrb[19].mxu0  ;;  %1327 = vmatpush1.bf16.msra.mxu0 %v1326_v4  ;;  %1387 = vmatpush1.bf16.msra.mxu1 %v1326_v4  ;;  %v392_v11 = vld [vmem:[%s1968_s3 + $0x30] sm:$0xff] }
 0x152   :  { %v316_v14 = vadd.f32 %v315_v13, %v161_v9  ;;  %v391_v9 = vld [vmem:[%s1968_s3 + $0x28] sm:$0xff]  ;;  %v393_v13 = vld [vmem:[%s1968_s3 + $0x38] sm:$0xff] }
 0x153   :  { %v372_v16 = vmax.f32 %v314_v12, 0.0  ;;  %v389_v12 = vld [vmem:[%s1968_s3 + $0x18] sm:$0xff] }
 0x154   :  { %v373_v18 = vmax.f32 %v316_v14, 0.0  ;;  %v319_v19 = vpop.f32.mrb[20].mxu0  ;;  %v394_v14 = vld [vmem:[%s1968_s3 + $0x40] sm:$0xff] }
 0x155   :  { %v1330_v20 = vpack.c.bf16 %v372_v16, %v370_v15  ;;  %v321_v21 = vpop.f32.mrb[21].mxu0  ;;  %v320_v24 = vadd.f32 %v319_v19, %v166_v22  ;;  %v395_v15 = vld [vmem:[%s1968_s3 + $0x48] sm:$0xff]  ;;  %v396_v16 = vld [vmem:[%s1968_s3 + $0x50] sm:$0xff] }
 0x156   :  { %v1328_v23 = vpack.c.bf16 %v373_v18, %v371_v17  ;;  %v322_v26 = vadd.f32 %v321_v21, %v166_v22  ;;  %v397_v17 = vld [vmem:[%s1968_s3 + $0x58] sm:$0xff]  ;;  %v398_v18 = vld [vmem:[%s1968_s3 + $0x60] sm:$0xff]  ;;  %v399_v19 = vld [vmem:[%s1968_s3 + $0x68] sm:$0xff]  ;;  %v421_v22 = vpop.permute.xlu0 %420 }
 0x157   :  { %v374_v31 = vmax.f32 %v320_v24, 0.0  ;;  %v401_v21 = vld [vmem:[%s1968_s3 + $0x78] sm:$0xff] }
 0x158   :  { %v325_v27 = vpop.f32.mrb[22].mxu0  ;;  %1329 = vmatprep.subr.bf16.mxu0 %v1328_v23  ;;  %1380 = vmatprep.subr.bf16.mxu1 %v1328_v23  ;;  %v375_v33 = vmax.f32 %v322_v26, 0.0  ;;  %v426_v23 = vpop.permute.xlu1 %425 }
 0x159   :  { %v326_v28 = vadd.f32 %v325_v27, %v171_v25  ;;  %v327_v29 = vpop.f32.mrb[23].mxu0  ;;  %1331 = vmatpush1.bf16.msra.mxu0 %v1330_v20  ;;  %1388 = vmatpush1.bf16.msra.mxu1 %v1330_v20  ;;  %v400_v20 = vld [vmem:[%s1968_s3 + $0x70] sm:$0xff]  ;;  %s1455_s3 = smov [#allocation6]  }
 0x15a   :  { %v328_v30 = vadd.f32 %v327_v29, %v171_v25  ;;  %v431_v24 = vpop.permute.xlu0 %430  ;;  %s1207_s27 = sshll.u32 %s1455_s3, 4  ;;  %s1208_s27 = int_to_ptr.vmem [resolvable:$true] %s1207_s27 }
 0x15b   :  { %v376_v32 = vmax.f32 %v326_v28, 0.0  ;;  %s1423_s28 = scalar_lea.vmem %s1208_s27, 32  ;;  %p1428_p9 = scmp.lt.s32.totalorder %s1208_s27, %s1208_s27 }
 0x15c   :  { %v377_v34 = vmax.f32 %v328_v30, 0.0  ;;  %v331_v35 = vpop.f32.mrb[24].mxu0  ;;  %v436_v25 = vpop.permute.xlu1 %435  ;;  %p1424_p8 = scmp.ne.s32.totalorder %s1208_s27, %s1423_s28  ;;  %p1429_p10 = scmp.lt.s32.totalorder %s1423_s28, %s1423_s28 }
 0x15d   :  { %v1334_v36 = vpack.c.bf16 %v376_v32, %v374_v31  ;;  %v333_v37 = vpop.f32.mrb[25].mxu0  ;;  %v332_v40 = vadd.f32 %v331_v35, %v176_v38 }
 0x15e   :  { %v1332_v39 = vpack.c.bf16 %v377_v34, %v375_v33  ;;  %v334_v42 = vadd.f32 %v333_v37, %v176_v38  ;;  %v441_v30 = vpop.permute.xlu0 %440  ;;  %p1430_p11 = por %p1429_p10, %p1428_p9 }
 0x15f   :  { %v378_v47 = vmax.f32 %v332_v40, 0.0 }
 0x160   :  { %v337_v43 = vpop.f32.mrb[26].mxu0  ;;  %1333 = vmatprep.subr.bf16.mxu0 %v1332_v39  ;;  %1381 = vmatprep.subr.bf16.mxu1 %v1332_v39  ;;  %v379_v49 = vmax.f32 %v334_v42, 0.0  ;;  %v446_v31 = vpop.permute.xlu1 %445  ;;  %p1431_p12 = pnand %p1430_p11, %p1424_p8 }
 0x161   :  { %v338_v44 = vadd.f32 %v337_v43, %v181_v41  ;;  %v339_v45 = vpop.f32.mrb[27].mxu0  ;;  %1335 = vmatpush1.bf16.msra.mxu0 %v1334_v36  ;;  %1389 = vmatpush1.bf16.msra.mxu1 %v1334_v36 }
 0x162   :  { %v340_v46 = vadd.f32 %v339_v45, %v181_v41 }
 0x163   :  { %v380_v48 = vmax.f32 %v338_v44, 0.0 }
 0x164   :  { %v381_v50 = vmax.f32 %v340_v46, 0.0  ;;  %v343_v51 = vpop.f32.mrb[28].mxu0 }
 0x165   :  { %v1338_v52 = vpack.c.bf16 %v380_v48, %v378_v47  ;;  %v345_v53 = vpop.f32.mrb[29].mxu0  ;;  %v344_v56 = vadd.f32 %v343_v51, %v186_v54 }
 0x166   :  { %v1336_v55 = vpack.c.bf16 %v381_v50, %v379_v49  ;;  %v346_v58 = vadd.f32 %v345_v53, %v186_v54 }
 0x167   :  { %v382_v63 = vmax.f32 %v344_v56, 0.0 }
 0x168   :  { %v349_v59 = vpop.f32.mrb[30].mxu0  ;;  %1337 = vmatprep.subr.bf16.mxu0 %v1336_v55  ;;  %1382 = vmatprep.subr.bf16.mxu1 %v1336_v55  ;;  %v383_v1 = vmax.f32 %v346_v58, 0.0  ;;  %v451_v58 = vpop.permute.xlu0 %450 }
 0x169   :  { %v350_v60 = vadd.f32 %v349_v59, %v191_v57  ;;  %v351_v61 = vpop.f32.mrb[31].mxu0  ;;  %1339 = vmatpush1.bf16.msra.mxu0 %v1338_v52  ;;  %1390 = vmatpush1.bf16.msra.mxu1 %v1338_v52 }
 0x16a   :  { %v352_v62 = vadd.f32 %v351_v61, %v191_v57  ;;  %v456_v61 = vpop.permute.xlu1 %455 }
 0x16b   :  { %v384_v0 = vmax.f32 %v350_v60, 0.0 }
 0x16c   :  { %v385_v2 = vmax.f32 %v352_v62, 0.0 }
 0x16d   :  { %v1342_v4 = vpack.c.bf16 %v384_v0, %v382_v63 }
 0x16e   :  { %v1340_v5 = vpack.c.bf16 %v385_v2, %v383_v1 }
 0x170   :  { %1341 = vmatprep.subr.bf16.mxu0 %v1340_v5  ;;  %1383 = vmatprep.subr.bf16.mxu1 %v1340_v5 }
 0x171   :  { %1343 = vmatpush1.bf16.msra.mxu0 %v1342_v4  ;;  %1391 = vmatpush1.bf16.msra.mxu1 %v1342_v4 }
 0x174   :  { %563 = vmatmul.mubr.f32.vlgmr.msra.gmra.mrb[32].mxu0 %v386_v6  ;;  %587 = vmatmul.mubr.f32.vlgmr.msra.gmra.mrb[0].mxu1 %v390_v7 }
 0x175   :  { %568 = vmatprep.mubr.f32.mxu0 %v1453_v3  ;;  %592 = vmatprep.mubr.f32.mxu1 %v1453_v3 }
 0x178   :  { %569 = vmatmul.mubr.f32.gmra.mrb[34].mxu0 %v387_v8  ;;  %593 = vmatmul.mubr.f32.gmra.mrb[2].mxu1 %v391_v9 }
 0x179   :  { %574 = vmatprep.mubr.f32.mxu0 %v1453_v3  ;;  %598 = vmatprep.mubr.f32.mxu1 %v1453_v3 }
 0x17c   :  { %575 = vmatmul.mubr.f32.gmra.mrb[36].mxu0 %v388_v10  ;;  %599 = vmatmul.mubr.f32.gmra.mrb[4].mxu1 %v392_v11 }
 0x17d   :  { %580 = vmatprep.mubr.f32.mxu0 %v1453_v3  ;;  %604 = vmatprep.mubr.f32.mxu1 %v1453_v3 }
 0x180   :  { %581 = vmatmul.mubr.f32.gmra.mrb[38].mxu0 %v389_v12  ;;  %605 = vmatmul.mubr.f32.gmra.mrb[6].mxu1 %v393_v13 }
 0x181   :  { %610 = vmatprep.mubr.f32.mxu1 %v1453_v3 }
 0x184   :  { %611 = vmatmul.mubr.f32.gmra.mrb[8].mxu1 %v394_v14 }
 0x185   :  { %616 = vmatprep.mubr.f32.mxu1 %v1453_v3 }
 0x188   :  { %617 = vmatmul.mubr.f32.gmra.mrb[10].mxu1 %v395_v15 }
 0x189   :  { %622 = vmatprep.mubr.f32.mxu1 %v1453_v3 }
 0x18c   :  { %623 = vmatmul.mubr.f32.gmra.mrb[12].mxu1 %v396_v16 }
 0x18d   :  { %628 = vmatprep.mubr.f32.mxu1 %v1453_v3 }
 0x190   :  { %629 = vmatmul.mubr.f32.gmra.mrb[14].mxu1 %v397_v17 }
 0x191   :  { %634 = vmatprep.mubr.f32.mxu1 %v1453_v3 }
 0x194   :  { %635 = vmatmul.mubr.f32.gmra.mrb[16].mxu1 %v398_v18 }
 0x195   :  { %640 = vmatprep.mubr.f32.mxu1 %v1453_v3 }
 0x198   :  { %641 = vmatmul.mubr.f32.gmra.mrb[18].mxu1 %v399_v19 }
 0x199   :  { %646 = vmatprep.mubr.f32.mxu1 %v1453_v3 }
 0x19c   :  { %647 = vmatmul.mubr.f32.gmra.mrb[20].mxu1 %v400_v20 }
 0x19d   :  { %652 = vmatprep.mubr.f32.mxu1 %v1453_v3 }
 0x1a0   :  { %653 = vmatmul.mubr.f32.gmra.mrb[22].mxu1 %v401_v21 }
 0x1a1   :  { %867 = vmatprep.mubr.f32.mxu1 %v1453_v3 }
 0x247   :  { %v564_v26 = vpop.f32.mrb[32].mxu0  ;;  %v588_v27 = vpop.f32.mrb[0].mxu1 }
 0x248   :  { %v566_v28 = vpop.f32.mrb[33].mxu0  ;;  %v590_v29 = vpop.f32.mrb[1].mxu1  ;;  %v565_v32 = vadd.f32 %v564_v26, %v421_v22  ;;  %v589_v33 = vadd.f32 %v588_v27, %v441_v30 }
 0x249   :  { %v567_v34 = vadd.f32 %v566_v28, %v421_v22  ;;  %v591_v35 = vadd.f32 %v590_v29, %v441_v30  ;;  %v466_v28 = vpop.permute.xlu1 %465 }
 0x24a   :  { %v659_v44 = vmax.f32 %v565_v32, 0.0  ;;  %v667_v45 = vmax.f32 %v589_v33, 0.0 }
 0x24b   :  { %v570_v36 = vpop.f32.mrb[34].mxu0  ;;  %v594_v37 = vpop.f32.mrb[2].mxu1  ;;  %v660_v48 = vmax.f32 %v567_v34, 0.0  ;;  %v668_v49 = vmax.f32 %v591_v35, 0.0 }
 0x24c   :  { %v571_v38 = vadd.f32 %v570_v36, %v426_v23  ;;  %v595_v39 = vadd.f32 %v594_v37, %v446_v31  ;;  %v572_v40 = vpop.f32.mrb[35].mxu0  ;;  %v596_v41 = vpop.f32.mrb[3].mxu1 }
 0x24d   :  { %v573_v42 = vadd.f32 %v572_v40, %v426_v23  ;;  %v597_v43 = vadd.f32 %v596_v41, %v446_v31  ;;  %v461_v23 = vpop.permute.xlu0 %460 }
 0x24e   :  { %v661_v46 = vmax.f32 %v571_v38, 0.0  ;;  %v669_v47 = vmax.f32 %v595_v39, 0.0 }
 0x24f   :  { %v662_v50 = vmax.f32 %v573_v42, 0.0  ;;  %v670_v51 = vmax.f32 %v597_v43, 0.0  ;;  %v576_v52 = vpop.f32.mrb[36].mxu0  ;;  %v600_v53 = vpop.f32.mrb[4].mxu1 }
 0x250   :  { %v1346_v54 = vpack.c.bf16 %v661_v46, %v659_v44  ;;  %v1354_v55 = vpack.c.bf16 %v669_v47, %v667_v45  ;;  %v578_v56 = vpop.f32.mrb[37].mxu0  ;;  %v602_v57 = vpop.f32.mrb[5].mxu1  ;;  %v577_v62 = vadd.f32 %v576_v52, %v431_v24  ;;  %v601_v63 = vadd.f32 %v600_v53, %v451_v58 }
 0x251   :  { %v1344_v59 = vpack.c.bf16 %v662_v50, %v660_v48  ;;  %v1352_v60 = vpack.c.bf16 %v670_v51, %v668_v49  ;;  %v579_v0 = vadd.f32 %v578_v56, %v431_v24  ;;  %v603_v1 = vadd.f32 %v602_v57, %v451_v58  ;;  %v471_v40 = vpop.permute.xlu0 %470  ;;  %v476_v43 = vpop.permute.xlu1 %475 }
 0x252   :  { %v663_v11 = vmax.f32 %v577_v62, 0.0  ;;  %v671_v12 = vmax.f32 %v601_v63, 0.0 }
 0x253   :  { %v582_v2 = vpop.f32.mrb[38].mxu0  ;;  %v606_v4 = vpop.f32.mrb[6].mxu1  ;;  %1345 = vmatprep.subr.bf16.mxu1 %v1344_v59  ;;  %v664_v15 = vmax.f32 %v579_v0, 0.0  ;;  %v672_v16 = vmax.f32 %v603_v1, 0.0 }
 0x254   :  { %v583_v5 = vadd.f32 %v582_v2, %v436_v25  ;;  %v607_v6 = vadd.f32 %v606_v4, %v456_v61  ;;  %v584_v7 = vpop.f32.mrb[39].mxu0  ;;  %v608_v8 = vpop.f32.mrb[7].mxu1  ;;  %1347 = vmatpush1.bf16.msra.mxu1 %v1346_v54 }
 0x255   :  { %v585_v9 = vadd.f32 %v584_v7, %v436_v25  ;;  %v609_v10 = vadd.f32 %v608_v8, %v456_v61  ;;  %v486_v59 = vpop.permute.xlu1 %485 }
 0x256   :  { %v665_v13 = vmax.f32 %v583_v5, 0.0  ;;  %v673_v14 = vmax.f32 %v607_v6, 0.0 }
 0x257   :  { %v666_v17 = vmax.f32 %v585_v9, 0.0  ;;  %v674_v18 = vmax.f32 %v609_v10, 0.0  ;;  %v612_v19 = vpop.f32.mrb[8].mxu1 }
 0x258   :  { %v1350_v20 = vpack.c.bf16 %v665_v13, %v663_v11  ;;  %v1358_v21 = vpack.c.bf16 %v673_v14, %v671_v12  ;;  %v614_v22 = vpop.f32.mrb[9].mxu1  ;;  %v613_v27 = vadd.f32 %v612_v19, %v461_v23 }
 0x259   :  { %v1348_v24 = vpack.c.bf16 %v666_v17, %v664_v15  ;;  %v1356_v26 = vpack.c.bf16 %v674_v18, %v672_v16  ;;  %v615_v29 = vadd.f32 %v614_v22, %v461_v23  ;;  %v496_v12 = vpop.permute.xlu1 %495 }
 0x25a   :  { %v675_v33 = vmax.f32 %v613_v27, 0.0  ;;  %v693_v27 = vld [vmem:[#allocation3 + $0x10] sm:$0xff] }
 0x25b   :  { %v618_v25 = vpop.f32.mrb[10].mxu1  ;;  %1349 = vmatprep.subr.bf16.mxu1 %v1348_v24  ;;  %v676_v35 = vmax.f32 %v615_v29, 0.0  ;;  %v691_v24 = vld [vmem:[#allocation3] sm:$0xff] }
 0x25c   :  { %v619_v30 = vadd.f32 %v618_v25, %v466_v28  ;;  %v620_v31 = vpop.f32.mrb[11].mxu1  ;;  %1351 = vmatpush1.bf16.msra.mxu1 %v1350_v20  ;;  %v695_v29 = vld [vmem:[#allocation3 + $0x20] sm:$0xff]  ;;  %v696_v25 = vld [vmem:[#allocation3 + $0x28] sm:$0xff] }
 0x25d   :  { %v621_v32 = vadd.f32 %v620_v31, %v466_v28  ;;  %1353 = vmatprep.subr.bf16.mxu1 %v1352_v60  ;;  %v694_v28 = vld [vmem:[#allocation3 + $0x18] sm:$0xff] }
 0x25e   :  { %v677_v34 = vmax.f32 %v619_v30, 0.0  ;;  %v697_v30 = vld [vmem:[#allocation3 + $0x30] sm:$0xff]  ;;  %v698_v31 = vld [vmem:[#allocation3 + $0x38] sm:$0xff] }
 0x25f   :  { %v678_v36 = vmax.f32 %v621_v32, 0.0  ;;  %v624_v37 = vpop.f32.mrb[12].mxu1  ;;  %v699_v32 = vld [vmem:[#allocation3 + $0x40] sm:$0xff] }
 0x260   :  { %v1362_v38 = vpack.c.bf16 %v677_v34, %v675_v33  ;;  %v626_v39 = vpop.f32.mrb[13].mxu1  ;;  %1355 = vmatpush1.bf16.msra.mxu1 %v1354_v55  ;;  %v625_v42 = vadd.f32 %v624_v37, %v471_v40  ;;  %v481_v55 = vpop.permute.xlu0 %480  ;;  %v700_v33 = vld [vmem:[#allocation3 + $0x48] sm:$0xff]  ;;  %v701_v34 = vld [vmem:[#allocation3 + $0x50] sm:$0xff] }
 0x261   :  { %v1360_v41 = vpack.c.bf16 %v678_v36, %v676_v35  ;;  %1357 = vmatprep.subr.bf16.mxu1 %v1356_v26  ;;  %v627_v44 = vadd.f32 %v626_v39, %v471_v40  ;;  %v692_v26 = vld [vmem:[#allocation3 + $0x8] sm:$0xff]  ;;  %v702_v35 = vld [vmem:[#allocation3 + $0x58] sm:$0xff]  ;;  %v703_v36 = vld [vmem:[#allocation3 + $0x60] sm:$0xff] }
 0x262   :  { %v679_v49 = vmax.f32 %v625_v42, 0.0  ;;  %v704_v37 = vld [vmem:[#allocation3 + $0x68] sm:$0xff]  ;;  %v706_v39 = vld [vmem:[#allocation3 + $0x78] sm:$0xff] }
 0x263   :  { %v630_v45 = vpop.f32.mrb[14].mxu1  ;;  %v680_v51 = vmax.f32 %v627_v44, 0.0 }
 0x264   :  { %v631_v46 = vadd.f32 %v630_v45, %v476_v43  ;;  %v632_v47 = vpop.f32.mrb[15].mxu1  ;;  %1359 = vmatpush1.bf16.msra.mxu1 %v1358_v21  ;;  %v491_v9 = vpop.permute.xlu0 %490 }
 0x265   :  { %v633_v48 = vadd.f32 %v632_v47, %v476_v43  ;;  %1361 = vmatprep.subr.bf16.mxu1 %v1360_v41  ;;  %v731_v41 = vpop.permute.xlu1 %730 }
 0x266   :  { %v681_v50 = vmax.f32 %v631_v46, 0.0 }
 0x267   :  { %v682_v52 = vmax.f32 %v633_v48, 0.0  ;;  %v636_v53 = vpop.f32.mrb[16].mxu1 }
 0x268   :  { %v1366_v54 = vpack.c.bf16 %v681_v50, %v679_v49  ;;  %v638_v56 = vpop.f32.mrb[17].mxu1  ;;  %1363 = vmatpush1.bf16.msra.mxu1 %v1362_v38  ;;  %v637_v58 = vadd.f32 %v636_v53, %v481_v55  ;;  %v705_v38 = vld [vmem:[#allocation3 + $0x70] sm:$0xff]  ;;  %v726_v40 = vpop.permute.xlu0 %725 }
 0x269   :  { %v1364_v57 = vpack.c.bf16 %v682_v52, %v680_v51  ;;  %v639_v60 = vadd.f32 %v638_v56, %v481_v55  ;;  %v741_v43 = vpop.permute.xlu1 %740 }
 0x26a   :  { %v683_v1 = vmax.f32 %v637_v58, 0.0 }
 0x26b   :  { %v642_v61 = vpop.f32.mrb[18].mxu1  ;;  %1365 = vmatprep.subr.bf16.mxu1 %v1364_v57  ;;  %v684_v4 = vmax.f32 %v639_v60, 0.0 }
 0x26c   :  { %v643_v62 = vadd.f32 %v642_v61, %v486_v59  ;;  %v644_v63 = vpop.f32.mrb[19].mxu1  ;;  %1367 = vmatpush1.bf16.msra.mxu1 %v1366_v54  ;;  %v736_v42 = vpop.permute.xlu0 %735 }
 0x26d   :  { %v645_v0 = vadd.f32 %v644_v63, %v486_v59  ;;  %v1020_v45 = vpop.permute.xlu1 %1019 }
 0x26e   :  { %v685_v2 = vmax.f32 %v643_v62, 0.0 }
 0x26f   :  { %v686_v5 = vmax.f32 %v645_v0, 0.0  ;;  %v648_v6 = vpop.f32.mrb[20].mxu1 }
 0x270   :  { %v1370_v7 = vpack.c.bf16 %v685_v2, %v683_v1  ;;  %v650_v8 = vpop.f32.mrb[21].mxu1  ;;  %v649_v11 = vadd.f32 %v648_v6, %v491_v9  ;;  %v1015_v44 = vpop.permute.xlu0 %1014 }
 0x271   :  { %v1368_v10 = vpack.c.bf16 %v686_v5, %v684_v4  ;;  %v651_v13 = vadd.f32 %v650_v8, %v491_v9  ;;  %v1025_v47 = vpop.permute.xlu1 %1024 }
 0x272   :  { %v687_v18 = vmax.f32 %v649_v11, 0.0 }
 0x273   :  { %v654_v14 = vpop.f32.mrb[22].mxu1  ;;  %1369 = vmatprep.subr.bf16.mxu1 %v1368_v10  ;;  %v688_v20 = vmax.f32 %v651_v13, 0.0 }
 0x274   :  { %v655_v15 = vadd.f32 %v654_v14, %v496_v12  ;;  %v656_v16 = vpop.f32.mrb[23].mxu1  ;;  %1371 = vmatpush1.bf16.msra.mxu1 %v1370_v7  ;;  %v746_v46 = vpop.permute.xlu0 %745 }
 0x275   :  { %v657_v17 = vadd.f32 %v656_v16, %v496_v12  ;;  %v1030_v49 = vpop.permute.xlu1 %1029 }
 0x276   :  { %v689_v19 = vmax.f32 %v655_v15, 0.0 }
 0x277   :  { %v690_v21 = vmax.f32 %v657_v17, 0.0 }
 0x278   :  { %v1374_v22 = vpack.c.bf16 %v689_v19, %v687_v18  ;;  %v751_v48 = vpop.permute.xlu0 %750 }
 0x279   :  { %v1372_v23 = vpack.c.bf16 %v690_v21, %v688_v20  ;;  %v1035_v54 = vpop.permute.xlu1 %1034 }
 0x27b   :  { %1373 = vmatprep.subr.bf16.mxu1 %v1372_v23 }
 0x27c   :  { %1375 = vmatpush1.bf16.msra.mxu1 %v1374_v22  ;;  %v1941_v50 = vpop.permute.xlu0 %755 }
 0x27d   :  { %v1040_v63 = vpop.permute.xlu1 %1039 }
 0x27f   :  { %868 = vmatmul.mubr.f32.vlgmr.msra.gmra.mrb[24].mxu1 %v691_v24 }
 0x280   :  { %873 = vmatprep.mubr.f32.mxu1 %v1453_v3  ;;  %v1943_v59 = vpop.permute.xlu0 %760 }
 0x281   :  { %v1045_v19 = vpop.permute.xlu1 %1044 }
 0x283   :  { %874 = vmatmul.mubr.f32.gmra.mrb[26].mxu1 %v692_v26 }
 0x284   :  { %879 = vmatprep.mubr.f32.mxu1 %v1453_v3  ;;  %v1945_v12 = vpop.permute.xlu0 %765 }
 0x287   :  { %880 = vmatmul.mubr.f32.gmra.mrb[28].mxu1 %v693_v27 }
 0x288   :  { %885 = vmatprep.mubr.f32.mxu1 %v1453_v3 }
 0x28b   :  { %886 = vmatmul.mubr.f32.gmra.mrb[30].mxu1 %v694_v28 }
 0x28c   :  { %891 = vmatprep.mubr.f32.mxu1 %v1453_v3 }
 0x28f   :  { %892 = vmatmul.mubr.f32.gmra.mrb[32].mxu1 %v695_v29 }
 0x290   :  { %897 = vmatprep.mubr.f32.mxu1 %v1453_v3 }
 0x293   :  { %898 = vmatmul.mubr.f32.gmra.mrb[34].mxu1 %v696_v25 }
 0x294   :  { %903 = vmatprep.mubr.f32.mxu1 %v1453_v3 }
 0x297   :  { %904 = vmatmul.mubr.f32.gmra.mrb[36].mxu1 %v697_v30  ;;  %v771_v30 = vpop.permute.xlu0 %770 }
 0x298   :  { %909 = vmatprep.mubr.f32.mxu1 %v1453_v3 }
 0x29b   :  { %910 = vmatmul.mubr.f32.gmra.mrb[38].mxu1 %v698_v31 }
 0x29c   :  { %915 = vmatprep.mubr.f32.mxu1 %v1453_v3 }
 0x29f   :  { %916 = vmatmul.mubr.f32.gmra.mrb[40].mxu1 %v699_v32 }
 0x2a0   :  { %921 = vmatprep.mubr.f32.mxu1 %v1453_v3 }
 0x2a3   :  { %922 = vmatmul.mubr.f32.gmra.mrb[42].mxu1 %v700_v33 }
 0x2a4   :  { %927 = vmatprep.mubr.f32.mxu1 %v1453_v3 }
 0x2a7   :  { %928 = vmatmul.mubr.f32.gmra.mrb[44].mxu1 %v701_v34 }
 0x2a8   :  { %933 = vmatprep.mubr.f32.mxu1 %v1453_v3 }
 0x2ab   :  { %934 = vmatmul.mubr.f32.gmra.mrb[46].mxu1 %v702_v35  ;;  %v1050_v35 = vpop.permute.xlu1 %1049 }
 0x2ac   :  { %939 = vmatprep.mubr.f32.mxu1 %v1453_v3 }
 0x2af   :  { %940 = vmatmul.mubr.f32.gmra.mrb[48].mxu1 %v703_v36 }
 0x2b0   :  { %945 = vmatprep.mubr.f32.mxu1 %v1453_v3 }
 0x2b3   :  { %946 = vmatmul.mubr.f32.gmra.mrb[50].mxu1 %v704_v37 }
 0x2b4   :  { %951 = vmatprep.mubr.f32.mxu1 %v1453_v3 }
 0x2b7   :  { %952 = vmatmul.mubr.f32.gmra.mrb[52].mxu1 %v705_v38 }
 0x2b8   :  { %957 = vmatprep.mubr.f32.mxu1 %v1453_v3 }
 0x2bb   :  { %958 = vmatmul.mubr.f32.gmra.mrb[54].mxu1 %v706_v39 }
 0x352   :  { %v869_v51 = vpop.f32.mrb[24].mxu1 }
 0x353   :  { %v870_v52 = vadd.f32 %v869_v51, %v726_v40  ;;  %v871_v53 = vpop.f32.mrb[25].mxu1 }
 0x354   :  { %v872_v56 = vadd.f32 %v871_v53, %v726_v40 }
 0x355   :  { %v964_v55 = vmax.f32 %v870_v52, 0.0 }
 0x356   :  { %v875_v3 = vpop.f32.mrb[26].mxu1  ;;  %v965_v60 = vmax.f32 %v872_v56, 0.0 }
 0x357   :  { %v876_v57 = vadd.f32 %v875_v3, %v731_v41  ;;  %v877_v58 = vpop.f32.mrb[27].mxu1  ;;  %v1092_v2 = vmul.f32 %v1015_v44, %v964_v55  ;;  %v1055_v3 = vpop.permute.xlu1 %1054 }
 0x358   :  { %v878_v61 = vadd.f32 %v877_v58, %v731_v41  ;;  %v1093_v7 = vmul.f32 %v1015_v44, %v965_v60 }
 0x359   :  { %v966_v62 = vmax.f32 %v876_v57, 0.0 }
 0x35a   :  { %v967_v0 = vmax.f32 %v878_v61, 0.0  ;;  %v881_v1 = vpop.f32.mrb[28].mxu1 }
 0x35b   :  { %v1094_v4 = vmul.f32 %v1020_v45, %v966_v62  ;;  %v882_v5 = vadd.f32 %v881_v1, %v736_v42  ;;  %v883_v6 = vpop.f32.mrb[29].mxu1 }
 0x35c   :  { %v1095_v8 = vmul.f32 %v1020_v45, %v967_v0  ;;  %v884_v9 = vadd.f32 %v883_v6, %v736_v42 }
 0x35d   :  { %v1124_v10 = vadd.f32 %v1094_v4, %v1092_v2  ;;  %v968_v11 = vmax.f32 %v882_v5, 0.0 }
 0x35e   :  { %v1145_v13 = vadd.f32 %v1095_v8, %v1093_v7  ;;  %v969_v14 = vmax.f32 %v884_v9, 0.0  ;;  %v887_v15 = vpop.f32.mrb[30].mxu1  ;;  %v1060_v8 = vpop.permute.xlu1 %1059 }
 0x35f   :  { %v1096_v16 = vmul.f32 %v1025_v47, %v968_v11  ;;  %v888_v17 = vadd.f32 %v887_v15, %v741_v43  ;;  %v889_v18 = vpop.f32.mrb[31].mxu1 }
 0x360   :  { %v1097_v20 = vmul.f32 %v1025_v47, %v969_v14  ;;  %v890_v21 = vadd.f32 %v889_v18, %v741_v43  ;;  %v776_v47 = vpop.permute.xlu0 %775 }
 0x361   :  { %v1125_v22 = vadd.f32 %v1124_v10, %v1096_v16  ;;  %v970_v23 = vmax.f32 %v888_v17, 0.0 }
 0x362   :  { %v1146_v24 = vadd.f32 %v1145_v13, %v1097_v20  ;;  %v971_v26 = vmax.f32 %v890_v21, 0.0  ;;  %v893_v27 = vpop.f32.mrb[32].mxu1 }
 0x363   :  { %v1098_v28 = vmul.f32 %v1030_v49, %v970_v23  ;;  %v894_v29 = vadd.f32 %v893_v27, %v746_v46  ;;  %v895_v25 = vpop.f32.mrb[33].mxu1 }
 0x364   :  { %v1099_v31 = vmul.f32 %v1030_v49, %v971_v26  ;;  %v896_v32 = vadd.f32 %v895_v25, %v746_v46  ;;  %v781_v2 = vpop.permute.xlu0 %780 }
 0x365   :  { %v1126_v33 = vadd.f32 %v1125_v22, %v1098_v28  ;;  %v972_v34 = vmax.f32 %v894_v29, 0.0 }
 0x366   :  { %v1147_v36 = vadd.f32 %v1146_v24, %v1099_v31  ;;  %v973_v37 = vmax.f32 %v896_v32, 0.0  ;;  %v899_v38 = vpop.f32.mrb[34].mxu1  ;;  %v1065_v24 = vpop.permute.xlu1 %1064 }
 0x367   :  { %v1100_v39 = vmul.f32 %v1035_v54, %v972_v34  ;;  %v900_v40 = vadd.f32 %v899_v38, %v751_v48  ;;  %v901_v41 = vpop.f32.mrb[35].mxu1 }
 0x368   :  { %v1101_v42 = vmul.f32 %v1035_v54, %v973_v37  ;;  %v902_v43 = vadd.f32 %v901_v41, %v751_v48  ;;  %v786_v18 = vpop.permute.xlu0 %785 }
 0x369   :  { %v1127_v44 = vadd.f32 %v1126_v33, %v1100_v39  ;;  %v974_v45 = vmax.f32 %v900_v40, 0.0 }
 0x36a   :  { %v1148_v51 = vadd.f32 %v1147_v36, %v1101_v42  ;;  %v975_v52 = vmax.f32 %v902_v43, 0.0  ;;  %v905_v53 = vpop.f32.mrb[36].mxu1  ;;  %v1070_v40 = vpop.permute.xlu1 %1069 }
 0x36b   :  { %v1102_v56 = vmul.f32 %v1040_v63, %v974_v45  ;;  %v906_v46 = vadd.f32 %v905_v53, %v1941_v50  ;;  %v907_v49 = vpop.f32.mrb[37].mxu1 }
 0x36c   :  { %v1103_v55 = vmul.f32 %v1040_v63, %v975_v52  ;;  %v908_v57 = vadd.f32 %v907_v49, %v1941_v50 }
 0x36d   :  { %v1128_v58 = vadd.f32 %v1127_v44, %v1102_v56  ;;  %v976_v60 = vmax.f32 %v906_v46, 0.0 }
 0x36e   :  { %v1149_v61 = vadd.f32 %v1148_v51, %v1103_v55  ;;  %v977_v62 = vmax.f32 %v908_v57, 0.0  ;;  %v911_v54 = vpop.f32.mrb[38].mxu1 }
 0x36f   :  { %v1104_v48 = vmul.f32 %v1045_v19, %v976_v60  ;;  %v912_v0 = vadd.f32 %v911_v54, %v1943_v59  ;;  %v913_v1 = vpop.f32.mrb[39].mxu1  ;;  %v1075_v60 = vpop.permute.xlu1 %1074 }
 0x370   :  { %v1105_v4 = vmul.f32 %v1045_v19, %v977_v62  ;;  %v914_v5 = vadd.f32 %v913_v1, %v1943_v59 }
 0x371   :  { %v1129_v6 = vadd.f32 %v1128_v58, %v1104_v48  ;;  %v978_v7 = vmax.f32 %v912_v0, 0.0 }
 0x372   :  { %v1150_v9 = vadd.f32 %v1149_v61, %v1105_v4  ;;  %v979_v63 = vmax.f32 %v914_v5, 0.0  ;;  %v917_v10 = vpop.f32.mrb[40].mxu1 }
 0x373   :  { %v1106_v50 = vmul.f32 %v1050_v35, %v978_v7  ;;  %v918_v11 = vadd.f32 %v917_v10, %v1945_v12  ;;  %v919_v13 = vpop.f32.mrb[41].mxu1 }
 0x374   :  { %v1107_v14 = vmul.f32 %v1050_v35, %v979_v63  ;;  %v920_v15 = vadd.f32 %v919_v13, %v1945_v12  ;;  %v791_v35 = vpop.permute.xlu0 %790 }
 0x375   :  { %v1130_v16 = vadd.f32 %v1129_v6, %v1106_v50  ;;  %v980_v17 = vmax.f32 %v918_v11, 0.0  ;;  %v1080_v50 = vpop.permute.xlu1 %1079 }
 0x376   :  { %v1151_v20 = vadd.f32 %v1150_v9, %v1107_v14  ;;  %v981_v19 = vmax.f32 %v920_v15, 0.0  ;;  %v923_v21 = vpop.f32.mrb[42].mxu1 }
 0x377   :  { %v1108_v59 = vmul.f32 %v1055_v3, %v980_v17  ;;  %v924_v22 = vadd.f32 %v923_v21, %v771_v30  ;;  %v925_v23 = vpop.f32.mrb[43].mxu1 }
 0x378   :  { %v1109_v26 = vmul.f32 %v1055_v3, %v981_v19  ;;  %v926_v27 = vadd.f32 %v925_v23, %v771_v30  ;;  %v796_v46 = vpop.permute.xlu0 %795 }
 0x379   :  { %v1131_v28 = vadd.f32 %v1130_v16, %v1108_v59  ;;  %v982_v29 = vmax.f32 %v924_v22, 0.0 }
 0x37a   :  { %v1152_v25 = vadd.f32 %v1151_v20, %v1109_v26  ;;  %v983_v31 = vmax.f32 %v926_v27, 0.0  ;;  %v929_v32 = vpop.f32.mrb[44].mxu1 }
 0x37b   :  { %v1110_v33 = vmul.f32 %v1060_v8, %v982_v29  ;;  %v930_v34 = vadd.f32 %v929_v32, %v776_v47  ;;  %v931_v12 = vpop.f32.mrb[45].mxu1 }
 0x37c   :  { %v1111_v36 = vmul.f32 %v1060_v8, %v983_v31  ;;  %v932_v37 = vadd.f32 %v931_v12, %v776_v47  ;;  %v801_v7 = vpop.permute.xlu0 %800 }
 0x37d   :  { %v1132_v38 = vadd.f32 %v1131_v28, %v1110_v33  ;;  %v984_v39 = vmax.f32 %v930_v34, 0.0  ;;  %v1090_v33 = vpop.permute.xlu1 %1089 }
 0x37e   :  { %v1153_v41 = vadd.f32 %v1152_v25, %v1111_v36  ;;  %v985_v42 = vmax.f32 %v932_v37, 0.0  ;;  %v935_v43 = vpop.f32.mrb[46].mxu1  ;;  %v1172_v37 = vlaneseq }
 0x37f   :  { %v1112_v44 = vmul.f32 %v1065_v24, %v984_v39  ;;  %v936_v45 = vadd.f32 %v935_v43, %v781_v2  ;;  %v937_v30 = vpop.f32.mrb[47].mxu1 }
 0x380   :  { %v1113_v51 = vmul.f32 %v1065_v24, %v985_v42  ;;  %v938_v52 = vadd.f32 %v937_v30, %v781_v2  ;;  %v1085_v59 = vpop.permute.xlu0 %1084  ;;  %v1173_v42 = vshrl.u32 %v1172_v37, 7  ;;  %v1454_v30 = vmov 1966171168  }
 0x381   :  { %v1133_v53 = vadd.f32 %v1132_v38, %v1112_v44  ;;  %v986_v56 = vmax.f32 %v936_v45, 0.0  ;;  %vm1198_vm0 = vcmp.lt.s32.totalorder %v1172_v37, 256 }
 0x382   :  { %v1154_v49 = vadd.f32 %v1153_v41, %v1113_v51  ;;  %v987_v3 = vmax.f32 %v938_v52, 0.0  ;;  %v941_v55 = vpop.f32.mrb[48].mxu1  ;;  %v1182_v51 = vunpack.c.l.s4 %v1454_v30 }
 0x383   :  { %v1114_v57 = vmul.f32 %v1070_v40, %v986_v56  ;;  %v942_v58 = vadd.f32 %v941_v55, %v786_v18  ;;  %v943_v47 = vpop.f32.mrb[49].mxu1 }
 0x384   :  { %v1115_v61 = vmul.f32 %v1070_v40, %v987_v3  ;;  %v944_v62 = vadd.f32 %v943_v47, %v786_v18  ;;  %v1183_v55 = vunpack.c.0.s8 %v1182_v51 }
 0x385   :  { %v1134_v54 = vadd.f32 %v1133_v53, %v1114_v57  ;;  %v988_v48 = vmax.f32 %v942_v58, 0.0  ;;  %v1174_v53 = vsub.s32 0, %v1173_v42 }
 0x386   :  { %v1155_v0 = vadd.f32 %v1154_v49, %v1115_v61  ;;  %v989_v1 = vmax.f32 %v944_v62, 0.0  ;;  %v947_v4 = vpop.f32.mrb[50].mxu1  ;;  %v1186_v62 = vsub.s32 %v1183_v55, %v1173_v42 }
 0x387   :  { %v1116_v5 = vmul.f32 %v1075_v60, %v988_v48  ;;  %v948_v6 = vadd.f32 %v947_v4, %v791_v35  ;;  %v949_v2 = vpop.f32.mrb[51].mxu1 }
 0x388   :  { %v1117_v8 = vmul.f32 %v1075_v60, %v989_v1  ;;  %v950_v9 = vadd.f32 %v949_v2, %v791_v35 }
 0x389   :  { %v1135_v63 = vadd.f32 %v1134_v54, %v1116_v5  ;;  %v990_v10 = vmax.f32 %v948_v6, 0.0 }
 0x38a   :  { %v1156_v11 = vadd.f32 %v1155_v0, %v1117_v8  ;;  %v991_v13 = vmax.f32 %v950_v9, 0.0  ;;  %v953_v14 = vpop.f32.mrb[52].mxu1 }
 0x38b   :  { %v1118_v15 = vmul.f32 %v1080_v50, %v990_v10  ;;  %v954_v16 = vadd.f32 %v953_v14, %v796_v46  ;;  %v955_v17 = vpop.f32.mrb[53].mxu1 }
 0x38c   :  { %v1119_v18 = vmul.f32 %v1080_v50, %v991_v13  ;;  %v956_v20 = vadd.f32 %v955_v17, %v796_v46  ;;  %v1170_v46 = vpop.permute.xlu0 %1169 }
 0x38d   :  { %v1136_v19 = vadd.f32 %v1135_v63, %v1118_v15  ;;  %v992_v21 = vmax.f32 %v954_v16, 0.0  ;;  %v1175_v58 = vrot.slane %v1170_v46, %v1174_v53 }
 0x38e   :  { %v1157_v22 = vadd.f32 %v1156_v11, %v1119_v18  ;;  %v993_v23 = vmax.f32 %v956_v20, 0.0  ;;  %v959_v24 = vpop.f32.mrb[54].mxu1 }
 0x38f   :  { %v1120_v26 = vmul.f32 %v1085_v59, %v992_v21  ;;  %v960_v27 = vadd.f32 %v959_v24, %v801_v7  ;;  %v961_v28 = vpop.f32.mrb[55].mxu1 }
 0x390   :  { %v1121_v29 = vmul.f32 %v1085_v59, %v993_v23  ;;  %v962_v25 = vadd.f32 %v961_v28, %v801_v7 }
 0x391   :  { %v1137_v31 = vadd.f32 %v1136_v19, %v1120_v26  ;;  %v994_v32 = vmax.f32 %v960_v27, 0.0 }
 0x392   :  { %v1158_v34 = vadd.f32 %v1157_v22, %v1121_v29  ;;  %v995_v12 = vmax.f32 %v962_v25, 0.0 }
 0x393   :  { %v1122_v35 = vmul.f32 %v1090_v33, %v994_v32 }
 0x394   :  { %v1123_v36 = vmul.f32 %v1090_v33, %v995_v12 }
 0x395   :  { %v1138_v38 = vadd.f32 %v1137_v31, %v1122_v35 }
 0x396   :  { %v1159_v39 = vadd.f32 %v1158_v34, %v1123_v36 }
 0x397   :  { %v1139_v40 = vrot.slane %v1138_v38, 4 }
 0x398   :  { %v1160_v41 = vrot.slane %v1159_v39, 4 }
 0x399   :  { %v1140_v43 = vadd.f32 %v1139_v40, %v1138_v38 }
 0x39a   :  { %v1161_v44 = vadd.f32 %v1160_v41, %v1159_v39 }
 0x39b   :  { %v1141_v45 = vrot.slane %v1140_v43, 2 }
 0x39c   :  { %v1162_v52 = vrot.slane %v1161_v44, 2 }
 0x39d   :  { %v1142_v56 = vadd.f32 %v1141_v45, %v1140_v43 }
 0x39e   :  { %v1163_v49 = vadd.f32 %v1162_v52, %v1161_v44 }
 0x39f   :  { %v1143_v3 = vrot.slane %v1142_v56, 1 }
 0x3a0   :  { %v1164_v57 = vrot.slane %v1163_v49, 1 }
 0x3a1   :  { %v1144_v47 = vadd.f32 %v1143_v3, %v1142_v56 }
 0x3a2   :  { %v1165_v60 = vadd.f32 %v1164_v57, %v1163_v49 }
 0x3a3   :  { %v1176_v61 = vadd.f32 %v1175_v58, %v1144_v47 }
 0x3a4   :  { %v1177_v54 = vadd.f32 %v1175_v58, %v1165_v60 }
 0x3a6   :  { %v1180_v48 = vcombine.low %v1176_v61, %v1177_v54 }
 0x3a8   :  { %v1187_v0 = vrot.slane %v1180_v48, %v1186_v62 }
 0x3aa   :  { %v1194_v1 = vrot.slane %v1187_v0, %v1186_v62 }
 0x3ac   :  { %1200 = vst.msk [vmem:[#allocation6] sm:$0x3] %vm1198_vm0, %v1194_v1 }
 0x3ad   :  { %1434 = shalt.err (!%p1431_p12)
}
 0x3ae   :  { %s1435_s0 = scalar_lea.hbm %s1974_s9, 32 }
 0x3af   :  { %p1436_p13 = scmp.ne.s32.totalorder %s1974_s9, %s1435_s0  ;;  %p1439_p0 = scmp.lt.u32.totalorder %s1435_s0, %s1974_s9 }
 0x3b1   :  { %p1441_p1 = pnand %p1439_p0, %p1436_p13 }
 0x3b3   :  { %1444 = shalt.err (!%p1441_p1)
}
 0x3b4   :  { %1210 = dma.vmem_to_hbm [thread:$0]  %s1208_s27, 32, %s1974_s9, [#allocation5]  }
 0x3b5   :  { %1447 = dma.done.wait [#allocation5], 32  }
 0x3b6   :  { %1448 = vsyncadd [#allocation5], 4294967264 }
 0x3b7   :  { %1214 = vsyncpa [#allocation4], 1 }
 0x3b8   :  { %1215 = vsyncpa [#allocation5], 1 }

</bundles_post_ra>
